<compile_context>
chip_gen: v5e
topology: v5e:2x2
jax: 0.10.0
libtpu: 0.0.40
codegen_flags: <defaults>
</compile_context>

<pallas_src>
import functools

import jax
import jax.numpy as jnp
import numpy as np
from jax import lax
from jax.experimental import pallas as pl
from jax.experimental.pallas import tpu as pltpu


# ----------------------------- Pallas kernel --------------------------------

def _residual_block_kernel(p1_ref, cmask_ref, w1s_ref, b1s_ref, w2_ref, b2_ref,
                           wa1_ref, ba1_ref, wa2_ref, ba2_ref,
                           o_ref, y1z_ref, tap_ref, *, m_img, wo, cout, pad):
    # --- conv1(+bn1) and 1x1 shortcut(+bn_s): one merged MXU pass (bf16) -----
    #   lanes [0:cout]       -> conv1    (ReLU'd, feeds conv2)
    #   lanes [cout:2*cout]  -> shortcut (taken PRE-ReLU, added at the end)
    y1sc = jnp.dot(p1_ref[...], w1s_ref[...],
                   preferred_element_type=jnp.float32) + b1s_ref[...]
    sc = y1sc[:, cout:]                       # shortcut, pre-ReLU
    y1 = jnp.maximum(y1sc[:, :cout], 0.0)     # conv1, ReLU (f32)

    # --- zero-padded flat-pixel scratch: zero ONLY the two halos -------------
    zero_halo = jnp.zeros((pad, cout), y1z_ref.dtype)
    y1z_ref[0:pad, :] = zero_halo
    y1z_ref[pad + m_img:pad + m_img + pad, :] = zero_halo
    y1z_ref[pad:pad + m_img, :] = y1

    # --- build the (M, 9*Cout) tap matrix: 9 statically shifted slices -------
    # Vertical out-of-image taps read the genuine zero halo (per-image grid);
    # horizontal wrap-around is killed by the precomputed column masks.
    cm_l = cmask_ref[:, :cout]      # dest col > 0      (valid for ox = -1)
    cm_r = cmask_ref[:, cout:]      # dest col < wo - 1 (valid for ox = +1)
    for oy in (-1, 0, 1):
        for ox in (-1, 0, 1):
            t = (oy + 1) * 3 + (ox + 1)
            s = pad + oy * wo + ox
            tap = y1z_ref[s:s + m_img, :]           # (M, Cout) f32
            if ox == -1:
                tap = tap * cm_l
            elif ox == 1:
                tap = tap * cm_r
            tap_ref[:, t * cout:(t + 1) * cout] = tap.astype(tap_ref.dtype)

    # --- conv2(+bn2): a single long-K (9*Cout) MXU matmul --------------------
    y2 = jnp.dot(tap_ref[...], w2_ref[...],
                 preferred_element_type=jnp.float32) + b2_ref[...]

    # --- channel attention (avg_pool2d(x, 1) == identity -> per-pixel gate) --
    hid = jnp.maximum(
        jnp.dot(y2.astype(wa1_ref.dtype), wa1_ref[...],
                preferred_element_type=jnp.float32) + ba1_ref[...], 0.0)
    att = jax.nn.sigmoid(
        jnp.dot(hid.astype(wa2_ref.dtype), wa2_ref[...],
                preferred_element_type=jnp.float32) + ba2_ref[...])

    # --- residual add + final ReLU (f32 elementwise) --------------------------
    o_ref[...] = jnp.maximum(y2 * att + sc, 0.0).astype(o_ref.dtype)


# ----------------------------- wrapper / glue --------------------------------

def extract_patches_3x3(x_nhwc, stride):
    """im2col for a 3x3 conv with padding=1; returns (N*Ho*Wo, 9*C)."""
    N, H, W, C = x_nhwc.shape
    xp = jnp.pad(x_nhwc, ((0, 0), (1, 1), (1, 1), (0, 0)))
    Ho = (H - 1) // stride + 1
    Wo = (W - 1) // stride + 1
    taps = []
    for dy in range(3):
        for dx in range(3):
            taps.append(xp[:, dy:dy + (Ho - 1) * stride + 1:stride,
                              dx:dx + (Wo - 1) * stride + 1:stride, :])
    p = jnp.stack(taps, axis=3)               # (N, Ho, Wo, 9, C)
    return p.reshape(N * Ho * Wo, 9 * C), (N, Ho, Wo)


def conv_w_to_mat(w):
    """(Cout, Cin, kh, kw) -> (kh*kw*Cin, Cout), matching patch ordering."""
    cout, cin, kh, kw = w.shape
    return jnp.transpose(w, (2, 3, 1, 0)).reshape(kh * kw * cin, cout)


def fold_bn(gamma, beta, mean, var, eps=1e-5):
    scale = gamma / jnp.sqrt(var + eps)
    return scale, beta - mean * scale


def residual_block_forward(x_nhwc, p, stride):
    """Pallas-backed forward pass (NHWC in / NHWC out), eval-mode BN."""
    Cin = x_nhwc.shape[-1]
    Cout = p["w1"].shape[0]
    Cmid = p["wa1"].shape[0]
    CA = 8                                     # attention hidden padded to 8

    # conv1 im2col (stride); the centre-tap rows also feed the 1x1 shortcut.
    p1, (n, ho, wo) = extract_patches_3x3(x_nhwc, stride)
    Mi = ho * wo                               # pixels per image (one grid step)
    assert Mi % 8 == 0, "per-image pixel count must be a multiple of 8"

    PAD = ((wo + 1 + 7) // 8) * 8              # halo rows: >= wo+1, multiple of 8
    assert PAD >= wo + 1 and PAD % 8 == 0

    s1, b1 = fold_bn(p["bn1_g"], p["bn1_b"], p["bn1_m"], p["bn1_v"])
    s2, b2 = fold_bn(p["bn2_g"], p["bn2_b"], p["bn2_m"], p["bn2_v"])
    ss, sb = fold_bn(p["bns_g"], p["bns_b"], p["bns_m"], p["bns_v"])

    # BN scales folded into weights.  Merged conv1/shortcut operand:
    # conv1 in lanes [0:Cout], shortcut in lanes [Cout:2*Cout] (the kernel
    # slices the shortcut out PRE-ReLU -- keep these two in sync).
    w1m = conv_w_to_mat(p["w1"]) * s1[None, :]             # (9*Cin, Cout)
    wsm = conv_w_to_mat(p["ws"]) * ss[None, :]              # (Cin, Cout)
    ws_full = jnp.zeros_like(w1m).at[4 * Cin:5 * Cin, :].set(wsm)
    w1s = jnp.concatenate([w1m, ws_full], axis=1)           # (9*Cin, 2*Cout)
    b1s = jnp.concatenate([b1, sb]).reshape(1, 2 * Cout)

    # conv2: plain (9*Cout, Cout) -- no zero shortcut rows any more.
    w2m = conv_w_to_mat(p["w2"]) * s2[None, :]
    b2r = b2.reshape(1, Cout)

    # attention 1x1 convs; hidden dim (Cout//8) zero-padded to 8 lanes.
    wa1p = jnp.zeros((Cout, CA), jnp.float32).at[:, :Cmid].set(
        conv_w_to_mat(p["wa1"]))
    ba1p = jnp.zeros((1, CA), jnp.float32).at[:, :Cmid].set(p["ba1"][None, :])
    wa2p = jnp.zeros((CA, Cout), jnp.float32).at[:Cmid, :].set(
        conv_w_to_mat(p["wa2"]))
    ba2p = p["ba2"].reshape(1, Cout)

    # Trace-time column wrap-around masks for the ox = +/-1 taps (per image).
    col = np.arange(Mi) % wo
    cm_l = np.repeat((col > 0).astype(np.float32)[:, None], Cout, axis=1)
    cm_r = np.repeat((col < wo - 1).astype(np.float32)[:, None], Cout, axis=1)
    cmask = jnp.asarray(np.concatenate([cm_l, cm_r], axis=1))  # (Mi, 2*Cout)

    bf16 = jnp.bfloat16
    args = (p1.astype(bf16), cmask, w1s.astype(bf16), b1s, w2m.astype(bf16),
            b2r, wa1p.astype(bf16), ba1p, wa2p.astype(bf16), ba2p)

    rep = lambda a: pl.BlockSpec(a.shape, lambda i: (0, 0))
    in_specs = ([pl.BlockSpec((Mi, 9 * Cin), lambda i: (i, 0))]
                + [rep(a) for a in args[1:]])

    kern = functools.partial(_residual_block_kernel, m_img=Mi, wo=wo,
                             cout=Cout, pad=PAD)
    out = pl.pallas_call(
        kern,
        out_shape=jax.ShapeDtypeStruct((n * Mi, Cout), jnp.float32),
        grid_spec=pltpu.PrefetchScalarGridSpec(
            num_scalar_prefetch=0,
            grid=(n,),                                   # one image per step
            in_specs=in_specs,
            out_specs=pl.BlockSpec((Mi, Cout), lambda i: (i, 0)),
            scratch_shapes=[
                pltpu.VMEM((Mi + 2 * PAD, Cout), jnp.float32),   # padded y1
                pltpu.VMEM((Mi, 9 * Cout), bf16),                # conv2 taps
            ]),
        compiler_params=pltpu.CompilerParams(
            dimension_semantics=("parallel",)),          # v7x: images per core
    )(*args)
    return out.reshape(n, ho, wo, Cout)


# ----------------------------- pure-JAX reference ---------------------------

def _ref_conv(x, w, stride, padding):
    return lax.conv_general_dilated(
        x, jnp.transpose(w, (2, 3, 1, 0)),
        window_strides=(stride, stride), padding=padding,
        dimension_numbers=("NHWC", "HWIO", "NHWC"))


def _ref_bn(x, g, b, m, v, eps=1e-5):
    return (x - m) / jnp.sqrt(v + eps) * g + b


def residual_block_reference(x_nhwc, p, stride):
    out = jax.nn.relu(_ref_bn(_ref_conv(x_nhwc, p["w1"], stride, ((1, 1), (1, 1))),
                              p["bn1_g"], p["bn1_b"], p["bn1_m"], p["bn1_v"]))
    out = _ref_bn(_ref_conv(out, p["w2"], 1, ((1, 1), (1, 1))),
                  p["bn2_g"], p["bn2_b"], p["bn2_m"], p["bn2_v"])
    att = jax.nn.relu(_ref_conv(out, p["wa1"], 1, ((0, 0), (0, 0))) + p["ba1"])
    att = jax.nn.sigmoid(_ref_conv(att, p["wa2"], 1, ((0, 0), (0, 0))) + p["ba2"])
    out = out * att
    sc = _ref_bn(_ref_conv(x_nhwc, p["ws"], stride, ((0, 0), (0, 0))),
                 p["bns_g"], p["bns_b"], p["bns_m"], p["bns_v"])
    return jax.nn.relu(out + sc)


# ------------------------------------ main -----------------------------------

if __name__ == "__main__":
    N, Cin, H, W = 2, 8, 16, 16        # PyTorch-style NCHW shape: (2, 8, 16, 16)
    Cout, stride = 16, 2
    Cmid = Cout // 8

    keys = jax.random.split(jax.random.PRNGKey(0), 24)
    nrm = lambda k, s, sc=0.1: sc * jax.random.normal(k, s, jnp.float32)

    x_nchw = jax.random.normal(keys[0], (N, Cin, H, W), jnp.float32)
    x_nhwc = jnp.transpose(x_nchw, (0, 2, 3, 1))

    params = dict(
        w1=nrm(keys[1], (Cout, Cin, 3, 3)),
        w2=nrm(keys[2], (Cout, Cout, 3, 3)),
        ws=nrm(keys[3], (Cout, Cin, 1, 1)),
        wa1=nrm(keys[4], (Cmid, Cout, 1, 1)), ba1=nrm(keys[5], (Cmid,)),
        wa2=nrm(keys[6], (Cout, Cmid, 1, 1)), ba2=nrm(keys[7], (Cout,)),
        bn1_g=1.0 + nrm(keys[8], (Cout,)),  bn1_b=nrm(keys[9], (Cout,)),
        bn1_m=nrm(keys[10], (Cout,)),       bn1_v=0.5 + jnp.abs(nrm(keys[11], (Cout,), 1.0)),
        bn2_g=1.0 + nrm(keys[12], (Cout,)), bn2_b=nrm(keys[13], (Cout,)),
        bn2_m=nrm(keys[14], (Cout,)),       bn2_v=0.5 + jnp.abs(nrm(keys[15], (Cout,), 1.0)),
        bns_g=1.0 + nrm(keys[16], (Cout,)), bns_b=nrm(keys[17], (Cout,)),
        bns_m=nrm(keys[18], (Cout,)),       bns_v=0.5 + jnp.abs(nrm(keys[19], (Cout,), 1.0)),
    )

    fwd = jax.jit(functools.partial(residual_block_forward, stride=stride))
    out = jax.block_until_ready(fwd(x_nhwc, params))

    ref = jax.block_until_ready(residual_block_reference(x_nhwc, params, stride))
    # Tolerance sized for bf16 MXU operands with f32 accumulation.
    np.testing.assert_allclose(np.asarray(out), np.asarray(ref),
                               rtol=3e-2, atol=3e-2)

    print("KERNEL_OK")
</pallas_src>

<mosaic_0001>
module attributes {stable_mosaic.version = 11 : i64} {
  func.func @_residual_block_kernel(%arg0: i32, %arg1: memref<64x72xbf16, #tpu.memory_space<vmem>>, %arg2: memref<64x32xf32, #tpu.memory_space<vmem>>, %arg3: memref<72x32xbf16, #tpu.memory_space<vmem>>, %arg4: memref<1x32xf32, #tpu.memory_space<vmem>>, %arg5: memref<144x16xbf16, #tpu.memory_space<vmem>>, %arg6: memref<1x16xf32, #tpu.memory_space<vmem>>, %arg7: memref<16x8xbf16, #tpu.memory_space<vmem>>, %arg8: memref<1x8xf32, #tpu.memory_space<vmem>>, %arg9: memref<8x16xbf16, #tpu.memory_space<vmem>>, %arg10: memref<1x16xf32, #tpu.memory_space<vmem>>, %arg11: memref<64x16xf32, #tpu.memory_space<vmem>>, %arg12: memref<96x16xf32, #tpu.memory_space<vmem>>, %arg13: memref<64x144xbf16, #tpu.memory_space<vmem>>) attributes {dimension_semantics = [#tpu.dimension_semantics<parallel>], iteration_bounds = array<i64: 2>, scalar_prefetch = 0 : i64, scratch_operands = 2 : i64, tpu.core_type = #tpu.core_type<tc>, window_params = [{transform_indices = @transform_0, window_bounds = array<i64: 64, 72>}, {pipeline_mode = #tpu.pipeline_mode<synchronous>, transform_indices = @transform_1, window_bounds = array<i64: 64, 32>}, {pipeline_mode = #tpu.pipeline_mode<synchronous>, transform_indices = @transform_2, window_bounds = array<i64: 72, 32>}, {pipeline_mode = #tpu.pipeline_mode<synchronous>, transform_indices = @transform_3, window_bounds = array<i64: 1, 32>}, {pipeline_mode = #tpu.pipeline_mode<synchronous>, transform_indices = @transform_4, window_bounds = array<i64: 144, 16>}, {pipeline_mode = #tpu.pipeline_mode<synchronous>, transform_indices = @transform_5, window_bounds = array<i64: 1, 16>}, {pipeline_mode = #tpu.pipeline_mode<synchronous>, transform_indices = @transform_6, window_bounds = array<i64: 16, 8>}, {pipeline_mode = #tpu.pipeline_mode<synchronous>, transform_indices = @transform_7, window_bounds = array<i64: 1, 8>}, {pipeline_mode = #tpu.pipeline_mode<synchronous>, transform_indices = @transform_8, window_bounds = array<i64: 8, 16>}, {pipeline_mode = #tpu.pipeline_mode<synchronous>, transform_indices = @transform_9, window_bounds = array<i64: 1, 16>}, {transform_indices = @transform_10, window_bounds = array<i64: 64, 16>}]} {
    %c0 = arith.constant 0 : index
    %c0_0 = arith.constant 0 : index
    %0 = vector.load %arg1[%c0, %c0_0] : memref<64x72xbf16, #tpu.memory_space<vmem>>, vector<64x72xbf16>
    %c0_1 = arith.constant 0 : index
    %c0_2 = arith.constant 0 : index
    %1 = vector.load %arg3[%c0_1, %c0_2] : memref<72x32xbf16, #tpu.memory_space<vmem>>, vector<72x32xbf16>
    %cst = arith.constant dense<0.000000e+00> : vector<64x32xf32>
    %2 = tpu.matmul %0, %1, %cst {dimension_numbers = #tpu.dot_dimension_numbers<[1], [0], [0], [1], [0, 0, 1, 1], [], []>} : vector<64x72xbf16>, vector<72x32xbf16>, vector<64x32xf32> -> vector<64x32xf32>
    %c0_3 = arith.constant 0 : index
    %c0_4 = arith.constant 0 : index
    %3 = vector.load %arg4[%c0_3, %c0_4] : memref<1x32xf32, #tpu.memory_space<vmem>>, vector<1x32xf32>
    %4 = vector.broadcast %3 : vector<1x32xf32> to vector<64x32xf32>
    %5 = arith.addf %2, %4 : vector<64x32xf32>
    %6 = vector.extract_strided_slice %5 {offsets = [0, 16], sizes = [64, 16], strides = [1, 1]} : vector<64x32xf32> to vector<64x16xf32>
    %7 = vector.extract_strided_slice %5 {offsets = [0, 0], sizes = [64, 16], strides = [1, 1]} : vector<64x32xf32> to vector<64x16xf32>
    %cst_5 = arith.constant 0.000000e+00 : f32
    %8 = vector.broadcast %cst_5 : f32 to vector<64x16xf32>
    %9 = arith.maximumf %7, %8 : vector<64x16xf32>
    %cst_6 = arith.constant 0.000000e+00 : f32
    %10 = vector.broadcast %cst_6 : f32 to vector<16x16xf32>
    %c0_7 = arith.constant 0 : index
    %c0_8 = arith.constant 0 : index
    %11 = vector.load %arg12[%c0_7, %c0_8] : memref<96x16xf32, #tpu.memory_space<vmem>>, vector<16x16xf32>
    tpu.vector_store %arg12[%c0_7, %c0_8], %10 {strides = array<i32>} : memref<96x16xf32, #tpu.memory_space<vmem>>, vector<16x16xf32>,
    %c80 = arith.constant 80 : index
    %c0_9 = arith.constant 0 : index
    %12 = vector.load %arg12[%c80, %c0_9] : memref<96x16xf32, #tpu.memory_space<vmem>>, vector<16x16xf32>
    tpu.vector_store %arg12[%c80, %c0_9], %10 {strides = array<i32>} : memref<96x16xf32, #tpu.memory_space<vmem>>, vector<16x16xf32>,
    %c16 = arith.constant 16 : index
    %c0_10 = arith.constant 0 : index
    %13 = vector.load %arg12[%c16, %c0_10] : memref<96x16xf32, #tpu.memory_space<vmem>>, vector<64x16xf32>
    tpu.vector_store %arg12[%c16, %c0_10], %9 {strides = array<i32>} : memref<96x16xf32, #tpu.memory_space<vmem>>, vector<64x16xf32>,
    %c0_11 = arith.constant 0 : index
    %c0_12 = arith.constant 0 : index
    %14 = vector.load %arg2[%c0_11, %c0_12] : memref<64x32xf32, #tpu.memory_space<vmem>>, vector<64x16xf32>
    %c0_13 = arith.constant 0 : index
    %c16_14 = arith.constant 16 : index
    %15 = vector.load %arg2[%c0_13, %c16_14] : memref<64x32xf32, #tpu.memory_space<vmem>>, vector<64x16xf32>
    %c7 = arith.constant 7 : index
    %c0_15 = arith.constant 0 : index
    %16 = vector.load %arg12[%c7, %c0_15] : memref<96x16xf32, #tpu.memory_space<vmem>>, vector<64x16xf32>
    %17 = arith.mulf %16, %14 : vector<64x16xf32>
    %18 = arith.truncf %17 : vector<64x16xf32> to vector<64x16xbf16>
    %c0_16 = arith.constant 0 : index
    %c0_17 = arith.constant 0 : index
    %19 = vector.load %arg13[%c0_16, %c0_17] : memref<64x144xbf16, #tpu.memory_space<vmem>>, vector<64x16xbf16>
    tpu.vector_store %arg13[%c0_16, %c0_17], %18 {strides = array<i32>} : memref<64x144xbf16, #tpu.memory_space<vmem>>, vector<64x16xbf16>,
    %c8 = arith.constant 8 : index
    %c0_18 = arith.constant 0 : index
    %20 = vector.load %arg12[%c8, %c0_18] : memref<96x16xf32, #tpu.memory_space<vmem>>, vector<64x16xf32>
    %21 = arith.truncf %20 : vector<64x16xf32> to vector<64x16xbf16>
    %c0_19 = arith.constant 0 : index
    %c16_20 = arith.constant 16 : index
    %22 = vector.load %arg13[%c0_19, %c16_20] : memref<64x144xbf16, #tpu.memory_space<vmem>>, vector<64x16xbf16>
    tpu.vector_store %arg13[%c0_19, %c16_20], %21 {strides = array<i32>} : memref<64x144xbf16, #tpu.memory_space<vmem>>, vector<64x16xbf16>,
    %c9 = arith.constant 9 : index
    %c0_21 = arith.constant 0 : index
    %23 = vector.load %arg12[%c9, %c0_21] : memref<96x16xf32, #tpu.memory_space<vmem>>, vector<64x16xf32>
    %24 = arith.mulf %23, %15 : vector<64x16xf32>
    %25 = arith.truncf %24 : vector<64x16xf32> to vector<64x16xbf16>
    %c0_22 = arith.constant 0 : index
    %c32 = arith.constant 32 : index
    %26 = vector.load %arg13[%c0_22, %c32] : memref<64x144xbf16, #tpu.memory_space<vmem>>, vector<64x16xbf16>
    tpu.vector_store %arg13[%c0_22, %c32], %25 {strides = array<i32>} : memref<64x144xbf16, #tpu.memory_space<vmem>>, vector<64x16xbf16>,
    %c15 = arith.constant 15 : index
    %c0_23 = arith.constant 0 : index
    %27 = vector.load %arg12[%c15, %c0_23] : memref<96x16xf32, #tpu.memory_space<vmem>>, vector<64x16xf32>
    %28 = arith.mulf %27, %14 : vector<64x16xf32>
    %29 = arith.truncf %28 : vector<64x16xf32> to vector<64x16xbf16>
    %c0_24 = arith.constant 0 : index
    %c48 = arith.constant 48 : index
    %30 = vector.load %arg13[%c0_24, %c48] : memref<64x144xbf16, #tpu.memory_space<vmem>>, vector<64x16xbf16>
    tpu.vector_store %arg13[%c0_24, %c48], %29 {strides = array<i32>} : memref<64x144xbf16, #tpu.memory_space<vmem>>, vector<64x16xbf16>,
    %c16_25 = arith.constant 16 : index
    %c0_26 = arith.constant 0 : index
    %31 = vector.load %arg12[%c16_25, %c0_26] : memref<96x16xf32, #tpu.memory_space<vmem>>, vector<64x16xf32>
    %32 = arith.truncf %31 : vector<64x16xf32> to vector<64x16xbf16>
    %c0_27 = arith.constant 0 : index
    %c64 = arith.constant 64 : index
    %33 = vector.load %arg13[%c0_27, %c64] : memref<64x144xbf16, #tpu.memory_space<vmem>>, vector<64x16xbf16>
    tpu.vector_store %arg13[%c0_27, %c64], %32 {strides = array<i32>} : memref<64x144xbf16, #tpu.memory_space<vmem>>, vector<64x16xbf16>,
    %c17 = arith.constant 17 : index
    %c0_28 = arith.constant 0 : index
    %34 = vector.load %arg12[%c17, %c0_28] : memref<96x16xf32, #tpu.memory_space<vmem>>, vector<64x16xf32>
    %35 = arith.mulf %34, %15 : vector<64x16xf32>
    %36 = arith.truncf %35 : vector<64x16xf32> to vector<64x16xbf16>
    %c0_29 = arith.constant 0 : index
    %c80_30 = arith.constant 80 : index
    %37 = vector.load %arg13[%c0_29, %c80_30] : memref<64x144xbf16, #tpu.memory_space<vmem>>, vector<64x16xbf16>
    tpu.vector_store %arg13[%c0_29, %c80_30], %36 {strides = array<i32>} : memref<64x144xbf16, #tpu.memory_space<vmem>>, vector<64x16xbf16>,
    %c23 = arith.constant 23 : index
    %c0_31 = arith.constant 0 : index
    %38 = vector.load %arg12[%c23, %c0_31] : memref<96x16xf32, #tpu.memory_space<vmem>>, vector<64x16xf32>
    %39 = arith.mulf %38, %14 : vector<64x16xf32>
    %40 = arith.truncf %39 : vector<64x16xf32> to vector<64x16xbf16>
    %c0_32 = arith.constant 0 : index
    %c96 = arith.constant 96 : index
    %41 = vector.load %arg13[%c0_32, %c96] : memref<64x144xbf16, #tpu.memory_space<vmem>>, vector<64x16xbf16>
    tpu.vector_store %arg13[%c0_32, %c96], %40 {strides = array<i32>} : memref<64x144xbf16, #tpu.memory_space<vmem>>, vector<64x16xbf16>,
    %c24 = arith.constant 24 : index
    %c0_33 = arith.constant 0 : index
    %42 = vector.load %arg12[%c24, %c0_33] : memref<96x16xf32, #tpu.memory_space<vmem>>, vector<64x16xf32>
    %43 = arith.truncf %42 : vector<64x16xf32> to vector<64x16xbf16>
    %c0_34 = arith.constant 0 : index
    %c112 = arith.constant 112 : index
    %44 = vector.load %arg13[%c0_34, %c112] : memref<64x144xbf16, #tpu.memory_space<vmem>>, vector<64x16xbf16>
    tpu.vector_store %arg13[%c0_34, %c112], %43 {strides = array<i32>} : memref<64x144xbf16, #tpu.memory_space<vmem>>, vector<64x16xbf16>,
    %c25 = arith.constant 25 : index
    %c0_35 = arith.constant 0 : index
    %45 = vector.load %arg12[%c25, %c0_35] : memref<96x16xf32, #tpu.memory_space<vmem>>, vector<64x16xf32>
    %46 = arith.mulf %45, %15 : vector<64x16xf32>
    %47 = arith.truncf %46 : vector<64x16xf32> to vector<64x16xbf16>
    %c0_36 = arith.constant 0 : index
    %c128 = arith.constant 128 : index
    %48 = vector.load %arg13[%c0_36, %c128] : memref<64x144xbf16, #tpu.memory_space<vmem>>, vector<64x16xbf16>
    tpu.vector_store %arg13[%c0_36, %c128], %47 {strides = array<i32>} : memref<64x144xbf16, #tpu.memory_space<vmem>>, vector<64x16xbf16>,
    %c0_37 = arith.constant 0 : index
    %c0_38 = arith.constant 0 : index
    %49 = vector.load %arg13[%c0_37, %c0_38] : memref<64x144xbf16, #tpu.memory_space<vmem>>, vector<64x144xbf16>
    %c0_39 = arith.constant 0 : index
    %c0_40 = arith.constant 0 : index
    %50 = vector.load %arg5[%c0_39, %c0_40] : memref<144x16xbf16, #tpu.memory_space<vmem>>, vector<144x16xbf16>
    %cst_41 = arith.constant dense<0.000000e+00> : vector<64x16xf32>
    %51 = tpu.matmul %49, %50, %cst_41 {dimension_numbers = #tpu.dot_dimension_numbers<[1], [0], [0], [1], [0, 0, 1, 1], [], []>} : vector<64x144xbf16>, vector<144x16xbf16>, vector<64x16xf32> -> vector<64x16xf32>
    %c0_42 = arith.constant 0 : index
    %c0_43 = arith.constant 0 : index
    %52 = vector.load %arg6[%c0_42, %c0_43] : memref<1x16xf32, #tpu.memory_space<vmem>>, vector<1x16xf32>
    %53 = vector.broadcast %52 : vector<1x16xf32> to vector<64x16xf32>
    %54 = arith.addf %51, %53 : vector<64x16xf32>
    %55 = arith.truncf %54 : vector<64x16xf32> to vector<64x16xbf16>
    %c0_44 = arith.constant 0 : index
    %c0_45 = arith.constant 0 : index
    %56 = vector.load %arg7[%c0_44, %c0_45] : memref<16x8xbf16, #tpu.memory_space<vmem>>, vector<16x8xbf16>
    %cst_46 = arith.constant dense<0.000000e+00> : vector<64x8xf32>
    %57 = tpu.matmul %55, %56, %cst_46 {dimension_numbers = #tpu.dot_dimension_numbers<[1], [0], [0], [1], [0, 0, 1, 1], [], []>} : vector<64x16xbf16>, vector<16x8xbf16>, vector<64x8xf32> -> vector<64x8xf32>
    %c0_47 = arith.constant 0 : index
    %c0_48 = arith.constant 0 : index
    %58 = vector.load %arg8[%c0_47, %c0_48] : memref<1x8xf32, #tpu.memory_space<vmem>>, vector<1x8xf32>
    %59 = vector.broadcast %58 : vector<1x8xf32> to vector<64x8xf32>
    %60 = arith.addf %57, %59 : vector<64x8xf32>
    %cst_49 = arith.constant 0.000000e+00 : f32
    %61 = vector.broadcast %cst_49 : f32 to vector<64x8xf32>
    %62 = arith.maximumf %60, %61 : vector<64x8xf32>
    %63 = arith.truncf %62 : vector<64x8xf32> to vector<64x8xbf16>
    %c0_50 = arith.constant 0 : index
    %c0_51 = arith.constant 0 : index
    %64 = vector.load %arg9[%c0_50, %c0_51] : memref<8x16xbf16, #tpu.memory_space<vmem>>, vector<8x16xbf16>
    %cst_52 = arith.constant dense<0.000000e+00> : vector<64x16xf32>
    %65 = tpu.matmul %63, %64, %cst_52 {dimension_numbers = #tpu.dot_dimension_numbers<[1], [0], [0], [1], [0, 0, 1, 1], [], []>} : vector<64x8xbf16>, vector<8x16xbf16>, vector<64x16xf32> -> vector<64x16xf32>
    %c0_53 = arith.constant 0 : index
    %c0_54 = arith.constant 0 : index
    %66 = vector.load %arg10[%c0_53, %c0_54] : memref<1x16xf32, #tpu.memory_space<vmem>>, vector<1x16xf32>
    %67 = vector.broadcast %66 : vector<1x16xf32> to vector<64x16xf32>
    %68 = arith.addf %65, %67 : vector<64x16xf32>
    %69 = arith.negf %68 : vector<64x16xf32>
    %70 = math.exp %69 : vector<64x16xf32>
    %cst_55 = arith.constant 1.000000e+00 : f32
    %71 = vector.broadcast %cst_55 : f32 to vector<64x16xf32>
    %72 = arith.addf %71, %70 : vector<64x16xf32>
    %73 = arith.divf %71, %72 : vector<64x16xf32>
    %74 = arith.mulf %54, %73 : vector<64x16xf32>
    %75 = arith.addf %74, %6 : vector<64x16xf32>
    %cst_56 = arith.constant 0.000000e+00 : f32
    %76 = vector.broadcast %cst_56 : f32 to vector<64x16xf32>
    %77 = arith.maximumf %75, %76 : vector<64x16xf32>
    %c0_57 = arith.constant 0 : index
    %c0_58 = arith.constant 0 : index
    %78 = vector.load %arg11[%c0_57, %c0_58] : memref<64x16xf32, #tpu.memory_space<vmem>>, vector<64x16xf32>
    tpu.vector_store %arg11[%c0_57, %c0_58], %77 {strides = array<i32>} : memref<64x16xf32, #tpu.memory_space<vmem>>, vector<64x16xf32>,
    return
  }
  func.func @transform_0(%arg0: i32) -> (i32, i32) {
    %c0_i32 = arith.constant 0 : i32
    %c0_i32_0 = arith.constant 0 : i32
    return %arg0, %c0_i32 : i32, i32
  }
  func.func @transform_1(%arg0: i32) -> (i32, i32) {
    %c0_i32 = arith.constant 0 : i32
    %c0_i32_0 = arith.constant 0 : i32
    %c0_i32_1 = arith.constant 0 : i32
    return %c0_i32, %c0_i32_0 : i32, i32
  }
  func.func @transform_2(%arg0: i32) -> (i32, i32) {
    %c0_i32 = arith.constant 0 : i32
    %c0_i32_0 = arith.constant 0 : i32
    %c0_i32_1 = arith.constant 0 : i32
    return %c0_i32, %c0_i32_0 : i32, i32
  }
  func.func @transform_3(%arg0: i32) -> (i32, i32) {
    %c0_i32 = arith.constant 0 : i32
    %c0_i32_0 = arith.constant 0 : i32
    %c0_i32_1 = arith.constant 0 : i32
    return %c0_i32, %c0_i32_0 : i32, i32
  }
  func.func @transform_4(%arg0: i32) -> (i32, i32) {
    %c0_i32 = arith.constant 0 : i32
    %c0_i32_0 = arith.constant 0 : i32
    %c0_i32_1 = arith.constant 0 : i32
    return %c0_i32, %c0_i32_0 : i32, i32
  }
  func.func @transform_5(%arg0: i32) -> (i32, i32) {
    %c0_i32 = arith.constant 0 : i32
    %c0_i32_0 = arith.constant 0 : i32
    %c0_i32_1 = arith.constant 0 : i32
    return %c0_i32, %c0_i32_0 : i32, i32
  }
  func.func @transform_6(%arg0: i32) -> (i32, i32) {
    %c0_i32 = arith.constant 0 : i32
    %c0_i32_0 = arith.constant 0 : i32
    %c0_i32_1 = arith.constant 0 : i32
    return %c0_i32, %c0_i32_0 : i32, i32
  }
  func.func @transform_7(%arg0: i32) -> (i32, i32) {
    %c0_i32 = arith.constant 0 : i32
    %c0_i32_0 = arith.constant 0 : i32
    %c0_i32_1 = arith.constant 0 : i32
    return %c0_i32, %c0_i32_0 : i32, i32
  }
  func.func @transform_8(%arg0: i32) -> (i32, i32) {
    %c0_i32 = arith.constant 0 : i32
    %c0_i32_0 = arith.constant 0 : i32
    %c0_i32_1 = arith.constant 0 : i32
    return %c0_i32, %c0_i32_0 : i32, i32
  }
  func.func @transform_9(%arg0: i32) -> (i32, i32) {
    %c0_i32 = arith.constant 0 : i32
    %c0_i32_0 = arith.constant 0 : i32
    %c0_i32_1 = arith.constant 0 : i32
    return %c0_i32, %c0_i32_0 : i32, i32
  }
  func.func @transform_10(%arg0: i32) -> (i32, i32) {
    %c0_i32 = arith.constant 0 : i32
    %c0_i32_0 = arith.constant 0 : i32
    return %arg0, %c0_i32 : i32, i32
  }
}

</mosaic_0001>

<bundles_post_ra>
// kernel: residual_block_forward.1
= control target key start
LH: loop header
LB: loop body
LE: loop exit
PB: predicated region body
PF: predicated region fallthrough
CT: control target
= control target key end

     0   :  { %15 = vsyncpa [#allocation5], 0  ;;  %s2617_s0 = inlined_call_operand.vmem [shape: bf16[128,72], index: 0, kind: input, shape index: {}]   ;;  %s2618_s1 = inlined_call_operand.vmem [shape: f32[64,32], index: 1, kind: input, shape index: {}]   ;;  %s2619_s2 = inlined_call_operand.vmem [shape: bf16[72,32], index: 2, kind: input, shape index: {}]   ;;  %s2620_s3 = inlined_call_operand.vmem [shape: f32[1,32], index: 3, kind: input, shape index: {}]   ;;  %s2621_s4 = inlined_call_operand.vmem [shape: bf16[144,16], index: 4, kind: input, shape index: {}]   ;;  %s2622_s5 = inlined_call_operand.vmem [shape: f32[1,16], index: 5, kind: input, shape index: {}]   ;;  %s2623_s6 = inlined_call_operand.vmem [shape: bf16[16,8], index: 6, kind: input, shape index: {}]   ;;  %s2624_s7 = inlined_call_operand.vmem [shape: f32[1,8], index: 7, kind: input, shape index: {}]   ;;  %s2625_s8 = inlined_call_operand.vmem [shape: bf16[8,16], index: 8, kind: input, shape index: {}]   ;;  %s2626_s9 = inlined_call_operand.vmem [shape: f32[1,16], index: 9, kind: input, shape index: {}]   ;;  %s2627_s10 = inlined_call_operand.hbm [shape: f32[128,16], index: 10, kind: output, shape index: {}]  }
   0x1   :  { %17 = vsyncpa [#allocation5 + $0x1], 0  ;;  %s2018_s13 = smov 0   ;;  %s2020_s14 = smov 0  }
   0x2   :  { %s2022_s15 = smov 0   ;;  %s2024_s16 = smov 0  }
   0x3 LB: > { %s2039_s17 = sadd.s32 4294967295, %s1951_s16   ;;  %s1636_s18 = sadd.s32 4294967294, %s1951_s16   ;;  %s1951_s16 = sphi %s2024_s16, %s2638_s16   ;;  %s1947_s15 = sphi %s2022_s15, %s2637_s15   ;;  %s1943_s14 = sphi %s2020_s14, %s2636_s14   ;;  %s1939_s13 = sphi %s2018_s13, %s2635_s13  }
   0x4   : > { %s2043_s19 = sadd.s32 1, %s1951_s16   ;;  %s245_s20 = sadd.s32 1, %s1947_s15 }
   0x5   : > { %s242_s21 = ssub.s32 %s1951_s16, %s2043_s19  ;;  %p255_p0 = scmp.ne.s32.totalorder %s1947_s15, %s1943_s14 }
   0x6   : > { %p243_p1 = scmp.eq.s32.totalorder %s242_s21, 0  ;;  %p256_p2 = scmp.eq.s32.totalorder %s2039_s17, 1 }
   0x7   : > { %p261_p3 = scmp.ne.s32.totalorder %s1943_s14, %s1939_s13  ;;  %p262_p4 = scmp.eq.s32.totalorder %s1636_s18, 1 }
   0x8   : > { %s2054_s22 = scalar_select %p243_p1, %s1947_s15, %s245_s20  }
   0x9   : > { %p2056_p5 = por %p256_p2, %p255_p0  ;;  %p2060_p6 = por %p262_p4, %p261_p3 }
   0xa   : > { %2630 = sst [smem:[#allocation7_spill]] %s2054_s22  ;;  %p1639_p7 = scmp.ge.s32.totalorder %s1951_s16, 1 }
   0xb   : > { %p316_p8 = scmp.lt.s32.totalorder %s1951_s16, 3 }
   0xd   : > { %p317_p9 = pnand %p1639_p7, %p316_p8 }
   0xe   : > { %s1641_s27 = sshll.u32 (!%p317_p9), %s2039_s17, 3  ;;  %s2628_s20 = smov (!%p317_p9), 112  }
   0xf   : > { %320 = sbr.rel (%p317_p9) target bundleno = 914 (0x392), region = 60  ;;  %p355_p10 = scmp.lt.s32.totalorder (!%p317_p9), %s1641_s27, 15 }
  0x10   : > { %s2633_s22 = smov (!%p317_p9), 112   ;;  %s1957_s11 = smov (!%p317_p9), 32  }
  0x11   : > { %s1958_s12 = smov (!%p317_p9), 48   ;;  %s1959_s18 = smov (!%p317_p9), 80  }
  0x12   : > { %s1960_s21 = smov (!%p317_p9), 96   ;;  %s351_s28 = sand.u32 (!%p317_p9), 1, %s1943_s14  }
  0x13   : > { %s1640_s29 = sshll.u32 (!%p317_p9), %s351_s28, 6  ;;  %s1559_s30 = scalar_lea.sflag (!%p317_p9), [#allocation5], %s351_s28 }
  0x14   : > { %v378_v0 = vld [vmem:[%s2619_s2 + $0x20] sm:$0xf]  ;;  %vm443_vm0 = vcmask 1043456   ;;  %v1783_v4 = vld [vmem:[%s2619_s2 + $0x18] sm:$0xff]  ;;  %v1782_v6 = vld [vmem:[%s2619_s2 + $0x10] sm:$0xff]  ;;  %s2640_s27 = smov (!%p355_p10, %s1641_s27), 15 }
  0x15   : > { %v420_v1 = vunpack.c.l.b16 %v378_v0  ;;  %v2077_v5 = vld [vmem:[%s2618_s1] sm:$0xff]  ;;  %v1781_v7 = vld [vmem:[%s2619_s2 + $0x8] sm:$0xff]  ;;  %s1642_s26 = sshll.u32 %s2640_s27, 2  ;;  %vm430_vm1 = vcmask 588800   ;;  %v2107_v11 = vld [vmem:[%s2618_s1 + $0x10] sm:$0xff]  ;;  %vm484_vm2 = vcmask 130048  }
  0x16   : > { %611 = vrot.lane.b32.xlu0 %v2077_v5, %s2628_s20  ;;  %v2090_v8 = vld [vmem:[%s2618_s1 + $0x8] sm:$0xff]  ;;  %v1780_v9 = vld [vmem:[%s2619_s2] sm:$0xff]  ;;  %s2098_s20 = scalar_lea.vmem %s2617_s0, %s1642_s26  ;;  %615 = vrot.lane.b32.xlu1 %v2107_v11, %s2633_s22  ;;  %v1954_v15 = vmov 0.0   ;;  %s1955_s27 = smov 16   ;;  %vm529_vm3 = vcmask 125952   ;;  %vm586_vm4 = vcmask 257152  }
  0x17   : > { %v425_v2 = vpack.c.b16 %v420_v1, %v420_v1  ;;  %v1776_v10 = vld [vmem:[%s2098_s20] sm:$0xff]  ;;  %v2114_v12 = vld [vmem:[%s2618_s1 + $0x18] sm:$0xff]  ;;  %v1777_v13 = vld [vmem:[%s2098_s20 + $0x8] sm:$0xff]  ;;  %486 = vst.msk [vmem:[#allocation2 + $0x8] sm:$0xff] %vm484_vm2, %v1954_v15  ;;  %vm683_vm5 = vcmask 388352   ;;  %vm748_vm6 = vcmask 519552  }
  0x18   : > { %v2123_v14 = vld [vmem:[%s2618_s1 + $0x20] sm:$0xff]  ;;  %v2131_v16 = vld [vmem:[%s2618_s1 + $0x38] sm:$0xff]  ;;  %485 = vst.msk [vmem:[#allocation2] sm:$0xff] %vm484_vm2, %v1954_v15  ;;  %v2141_v17 = vld [vmem:[%s2618_s1 + $0x28] sm:$0xff]  ;;  %vm805_vm7 = vcmask 650752   ;;  %vm870_vm8 = vcmask 781952  }
  0x19   : > { %v445_v3 = vsel %vm443_vm0, %v425_v2, 0  ;;  %619 = vrot.lane.b32.xlu2 %v2123_v14, %s2633_s22  ;;  %487 = vst.msk [vmem:[#allocation2 + $0x50] sm:$0xff] %vm484_vm2, %v1954_v15  ;;  %v1778_v20 = vld [vmem:[%s2098_s20 + $0x10] sm:$0xff]  ;;  %v1779_v22 = vld [vmem:[%s2098_s20 + $0x18] sm:$0xff]  ;;  %v2160_v23 = vld [vmem:[%s2620_s3] ss:$0 sm:$0xff] }
  0x1a   : > { %450 = vmatpush.bf16.msra.mxu0 %v445_v3  ;;  %488 = vst.msk [vmem:[#allocation2 + $0x58] sm:$0xff] %vm484_vm2, %v1954_v15  ;;  %v2151_v21 = vld [vmem:[%s2618_s1 + $0x30] sm:$0xff]  ;;  %s1956_s20 = smov 64   ;;  %v1800_v38 = vld [vmem:[%s2621_s4 + $0x40] sm:$0xff]  ;;  %vm935_vm9 = vcmask 913152   ;;  %vm992_vm10 = vcmask 1044352  }
  0x1b   : > { %1201 = vmatpush.bf16.msra.mxu2 %v1800_v38  ;;  %1803 = vmatpush.bf16.msra.mxu3 %v1800_v38  ;;  %vm1297_vm11 = vcmask 64512  }
  0x1e   : > { %451 = vmatpush.bf16.msra.mxu0 %v1783_v4  ;;  %613 = vrot.lane.b32.xlu0 %v2090_v8, %s2633_s22  ;;  %v538_v18 = vld [vmem:[#allocation2 + $0x8] sm:$0xff] }
  0x1f   : > { %617 = vrot.lane.b32.xlu1 %v2114_v12, %s2633_s22  ;;  %v546_v19 = vpack.c.bf16 %v538_v18, %v538_v18 }
  0x21   : > { %621 = vrot.lane.b32.xlu2 %v2141_v17, %s2633_s22 }
  0x22   : > { %452 = vmatpush.bf16.msra.mxu0 %v1782_v6 }
  0x26   : > { %453 = vmatpush.bf16.msra.mxu0 %v1781_v7  ;;  %562 = vrot.lane.b32.xlu0 %v546_v19, %s1955_s27 }
  0x27   : > { %625 = vrot.lane.b32.xlu1 %v2131_v16, %s2633_s22 }
  0x2a   : > { %454 = vmatpush.bf16.msra.mxu0 %v1780_v9 }
  0x2d   : > { %1675 = vmatmul.msk.bf16.vlgmr.msra.gmra.mxu0 %vm430_vm1, %v1776_v10 }
  0x2e   : > { %623 = vrot.lane.b32.xlu0 %v2151_v21, %s2633_s22 }
  0x3d   : > { %1676 = vmatmul.msk.bf16.gmra.mxu0 %vm430_vm1, %v1777_v13 }
  0x4d   : > { %1677 = vmatmul.msk.bf16.gmra.mxu0 %vm430_vm1, %v1778_v20 }
  0x5d   : > { %1678 = vmatmul.msk.bf16.gmra.mxu0 %vm430_vm1, %v1779_v22 }
  0x88   : > { %v2167_v28 = vpop.permute.xlu0 %611 }
  0x90   : > { %v614_v43 = vpop.permute.xlu0 %613 }
  0xaa   : > { %v456_v24 = vpop.f32.mrf.mxu0 }
  0xab   : > { %v2163_v25 = vadd.f32 %v2160_v23, %v456_v24  ;;  %v2227_v24 = vpop.permute.xlu1 %615 }
  0xad   : > { %v476_v26 = vmax.f32 %v2163_v25, 0.0 }
  0xaf   : > { %489 = vst.msk [vmem:[#allocation2 + $0x10] sm:$0xff] %vm484_vm2, %v476_v26 }
  0xb2   : > { %v458_v27 = vpop.f32.mrf.mxu0 }
  0xb3   : > { %v2170_v29 = vadd.f32 %v2160_v23, %v458_v27 }
  0xb5   : > { %v477_v30 = vmax.f32 %v2170_v29, 0.0 }
  0xb6   : > { %v595_v31 = vld [vmem:[#allocation2 + $0x9] sm:$0xff] }
  0xb7   : > { %v757_v32 = vld [vmem:[#allocation2 + $0x10] sm:$0xff]  ;;  %490 = vst.msk [vmem:[#allocation2 + $0x18] sm:$0xff] %vm484_vm2, %v477_v30  ;;  %v635_v34 = vmul.f32 %v2167_v28, %v595_v31  ;;  %v505_v31 = vld [vmem:[#allocation2 + $0x7] sm:$0xff] }
  0xb8   : > { %v692_v33 = vld [vmem:[#allocation2 + $0xf] sm:$0xff]  ;;  %v765_v35 = vpack.c.bf16 %v757_v32, %v757_v32  ;;  %v513_v32 = vmul.f32 %v505_v31, %v2077_v5 }
  0xb9   : > { %v514_v36 = vmul.f32 %v692_v33, %v2090_v8  ;;  %v643_v37 = vpack.c.bf16 %v635_v34, %v635_v34  ;;  %v700_v42 = vmul.f32 %v692_v33, %v2077_v5 }
  0xba   : > { %781 = vrot.lane.b32.xlu0 %v765_v35, %s1956_s20  ;;  %564 = vrot.lane.b32.xlu1 %v765_v35, %s1955_s27  ;;  %v461_v40 = vpop.f32.mrf.mxu0 }
  0xbb   : > { %v522_v39 = vpack.c.bf16 %v514_v36, %v514_v36  ;;  %v2182_v41 = vadd.f32 %v2160_v23, %v461_v40  ;;  %659 = vrot.lane.b32.xlu2 %v643_v37, %s1957_s11  ;;  %v708_v49 = vpack.c.bf16 %v700_v42, %v700_v42  ;;  %v521_v36 = vpack.c.bf16 %v513_v32, %v513_v32  ;;  %v563_v40 = vpop.permute.xlu0 %562  ;;  %v1008_v32 = vld [vmem:[#allocation2 + $0x51] sm:$0xff] }
  0xbd   : > { %531 = vst.msk [vmem:[#allocation3 + $0x8] sm:$0xf] %vm529_vm3, %v522_v39  ;;  %v478_v44 = vmax.f32 %v2182_v41, 0.0 }
  0xbe   : > { %v814_v45 = vld [vmem:[#allocation2 + $0x11] sm:$0xff]  ;;  %530 = vst.msk [vmem:[#allocation3] sm:$0xf] %vm529_vm3, %v521_v36 }
  0xbf   : > { %v944_v46 = vld [vmem:[#allocation2 + $0x18] sm:$0xff]  ;;  %491 = vst.msk [vmem:[#allocation2 + $0x20] sm:$0xff] %vm484_vm2, %v478_v44  ;;  %v636_v48 = vmul.f32 %v814_v45, %v614_v43  ;;  %v822_v6 = vmul.f32 %v814_v45, %v2167_v28 }
  0xc0   : > { %v693_v47 = vld [vmem:[#allocation2 + $0x17] sm:$0xff]  ;;  %v952_v52 = vpack.c.bf16 %v944_v46, %v944_v46  ;;  %587 = vst.msk [vmem:[#allocation3] sm:$0xf] %vm586_vm4, %v563_v40 }
  0xc1   : > { %v515_v50 = vmul.f32 %v693_v47, %v2107_v11  ;;  %v644_v51 = vpack.c.bf16 %v636_v48, %v636_v48  ;;  %v701_v57 = vmul.f32 %v693_v47, %v2090_v8  ;;  %v830_v22 = vpack.c.bf16 %v822_v6, %v822_v6 }
  0xc2   : > { %724 = vrot.lane.b32.xlu1 %v708_v49, %s1958_s12  ;;  %v463_v53 = vpop.f32.mrf.mxu0  ;;  %v887_v30 = vmul.f32 %v693_v47, %v2077_v5 }
  0xc3   : > { %v523_v54 = vpack.c.bf16 %v515_v50, %v515_v50  ;;  %v2192_v55 = vadd.f32 %v2160_v23, %v463_v53  ;;  %661 = vrot.lane.b32.xlu0 %v644_v51, %s1957_s11  ;;  %968 = vrot.lane.b32.xlu2 %v952_v52, %s2633_s22  ;;  %v709_v1 = vpack.c.bf16 %v701_v57, %v701_v57 }
  0xc4   : > { %v895_v39 = vpack.c.bf16 %v887_v30, %v887_v30 }
  0xc5   : > { %532 = vst.msk [vmem:[#allocation3 + $0x10] sm:$0xf] %vm529_vm3, %v523_v54  ;;  %v479_v56 = vmax.f32 %v2192_v55, 0.0 }
  0xc6   : > { %v1001_v58 = vld [vmem:[#allocation2 + $0x19] sm:$0xff] }
  0xc7   : > { %v945_v59 = vld [vmem:[#allocation2 + $0x20] sm:$0xff]  ;;  %v1009_v61 = vmul.f32 %v1001_v58, %v2167_v28  ;;  %492 = vst.msk [vmem:[#allocation2 + $0x28] sm:$0xff] %vm484_vm2, %v479_v56  ;;  %v823_v7 = vmul.f32 %v1001_v58, %v614_v43  ;;  %v637_v33 = vmul.f32 %v1001_v58, %v2227_v24 }
  0xc8   : > { %v2199_v60 = vld [vmem:[#allocation2 + $0x1f] sm:$0xff]  ;;  %v2203_v62 = vpack.c.bf16 %v945_v59, %v945_v59 }
  0xc9   : > { %v516_v63 = vmul.f32 %v2199_v60, %v2114_v12  ;;  %v1017_v0 = vpack.c.bf16 %v1009_v61, %v1009_v61  ;;  %v831_v20 = vpack.c.bf16 %v823_v7, %v823_v7  ;;  %v888_v51 = vmul.f32 %v2199_v60, %v2090_v8 }
  0xca   : > { %783 = vrot.lane.b32.xlu1 %v952_v52, %s1956_s20  ;;  %v466_v2 = vpop.f32.mrf.mxu0  ;;  %v702_v6 = vmul.f32 %v2199_v60, %v2107_v11 }
  0xcb   : > { %v524_v3 = vpack.c.bf16 %v516_v63, %v516_v63  ;;  %v2209_v4 = vadd.f32 %v2160_v23, %v466_v2  ;;  %970 = vrot.lane.b32.xlu0 %v2203_v62, %s2633_s22  ;;  %726 = vrot.lane.b32.xlu2 %v709_v1, %s1958_s12  ;;  %1025 = vst.msk [vmem:[#allocation3 + $0x4] sm:$0xf] %vm529_vm3, %v1017_v0  ;;  %v2283_v2 = vpop.permute.xlu2 %619 }
  0xcc   : > { %v896_v61 = vpack.c.bf16 %v888_v51, %v888_v51 }
  0xcd   : > { %533 = vst.msk [vmem:[#allocation3 + $0x18] sm:$0xf] %vm529_vm3, %v524_v3  ;;  %v480_v9 = vmax.f32 %v2209_v4, 0.0 }
  0xce   : > { %v2218_v10 = vld [vmem:[#allocation2 + $0x21] sm:$0xff] }
  0xcf   : > { %v2220_v13 = vld [vmem:[#allocation2 + $0x27] sm:$0xff]  ;;  %v1010_v15 = vmul.f32 %v2218_v10, %v614_v43  ;;  %493 = vst.msk [vmem:[#allocation2 + $0x30] sm:$0xff] %vm484_vm2, %v480_v9  ;;  %v645_v43 = vpack.c.bf16 %v637_v33, %v637_v33  ;;  %v824_v36 = vmul.f32 %v2218_v10, %v2227_v24 }
  0xd0   : > { %v517_v18 = vmul.f32 %v2220_v13, %v2123_v14  ;;  %v542_v54 = vld [vmem:[#allocation2 + $0x28] sm:$0xff]  ;;  %v889_v51 = vmul.f32 %v2220_v13, %v2107_v11 }
  0xd1   : > { %v1018_v19 = vpack.c.bf16 %v1010_v15, %v1010_v15  ;;  %v550_v8 = vpack.c.bf16 %v542_v54, %v542_v54 }
  0xd2   : > { %566 = vrot.lane.b32.xlu1 %v952_v52, %s1955_s27  ;;  %v468_v26 = vpop.f32.mrf.mxu0  ;;  %v525_v27 = vpack.c.bf16 %v517_v18, %v517_v18  ;;  %v1784_v45 = vld [vmem:[#allocation3 + $0x4] sm:$0xf]  ;;  %v2264_v52 = vpop.permute.xlu1 %617 }
  0xd3   : > { %v2230_v28 = vadd.f32 %v2160_v23, %v468_v26  ;;  %848 = vrot.lane.b32.xlu0 %v831_v20, %s1959_s18  ;;  %846 = vrot.lane.b32.xlu2 %v830_v22, %s1959_s18  ;;  %1026 = vst.msk [vmem:[#allocation3 + $0xc] sm:$0xf] %vm529_vm3, %v1018_v19  ;;  %v710_v20 = vpack.c.bf16 %v702_v6, %v702_v6  ;;  %v2306_v33 = vpop.permute.xlu2 %621 }
  0xd4   : > { %534 = vst.msk [vmem:[#allocation3 + $0x20] sm:$0xf] %vm529_vm3, %v525_v27  ;;  %v638_v27 = vmul.f32 %v2218_v10, %v2264_v52 }
  0xd5   : > { %v481_v34 = vmax.f32 %v2230_v28, 0.0 }
  0xd6   : > { %v2240_v35 = vld [vmem:[#allocation2 + $0x29] sm:$0xff] }
  0xd7   : > { %v2242_v37 = vld [vmem:[#allocation2 + $0x2f] sm:$0xff]  ;;  %v1011_v38 = vmul.f32 %v2240_v35, %v2227_v24  ;;  %494 = vst.msk [vmem:[#allocation2 + $0x38] sm:$0xff] %vm484_vm2, %v481_v34  ;;  %v832_v24 = vpack.c.bf16 %v824_v36, %v824_v36 }
  0xd8   : > { %v518_v5 = vmul.f32 %v2242_v37, %v2141_v17 }
  0xd9   : > { %v1019_v42 = vpack.c.bf16 %v1011_v38, %v1011_v38 }
  0xda   : > { %911 = vrot.lane.b32.xlu1 %v895_v39, %s1960_s21  ;;  %v471_v44 = vpop.f32.mrf.mxu0  ;;  %v1683_v46 = vld [vmem:[#allocation3 + $0x8] sm:$0xf0]  ;;  %v526_v47 = vpack.c.bf16 %v518_v5, %v518_v5  ;;  %v626_v31 = vpop.permute.xlu1 %625 }
  0xdb   : > { %v2253_v48 = vadd.f32 %v2160_v23, %v471_v44  ;;  %663 = vrot.lane.b32.xlu0 %v645_v43, %s1957_s11  ;;  %568 = vrot.lane.b32.xlu2 %v2203_v62, %s1955_s27  ;;  %v1686_v49 = vor.u32 %v1784_v45, %v1683_v46  ;;  %1027 = vst.msk [vmem:[#allocation3 + $0x14] sm:$0xf] %vm529_vm3, %v1019_v42  ;;  %v2314_v39 = vpop.permute.xlu0 %623 }
  0xdc   : > { %535 = vst.msk [vmem:[#allocation3 + $0x28] sm:$0xf] %vm529_vm3, %v526_v47  ;;  %v1016_v34 = vmul.f32 %v1008_v32, %v626_v31  ;;  %v646_v43 = vpack.c.bf16 %v638_v27, %v638_v27  ;;  %v1799_v27 = vld [vmem:[%s2621_s4 + $0x38] sm:$0xff] }
  0xdd   : > { %v482_v50 = vmax.f32 %v2253_v48, 0.0  ;;  %1747 = vmatmul.msk.bf16.vlgmr.msra.gmra.mxu2 %vm484_vm2, %v1686_v49  ;;  %v543_v49 = vld [vmem:[#allocation2 + $0x30] sm:$0xff]  ;;  %1165 = vmatpush.bf16.msra.mxu1 %v1799_v27 }
  0xde   : > { %v2266_v53 = vld [vmem:[#allocation2 + $0x31] sm:$0xff]  ;;  %v1024_v5 = vpack.c.bf16 %v1016_v34, %v1016_v34  ;;  %v1797_v34 = vld [vmem:[%s2621_s4 + $0x28] sm:$0xff] }
  0xdf   : > { %v2268_v56 = vld [vmem:[#allocation2 + $0x37] sm:$0xff]  ;;  %v1012_v57 = vmul.f32 %v2266_v53, %v2264_v52  ;;  %495 = vst.msk [vmem:[#allocation2 + $0x40] sm:$0xff] %vm484_vm2, %v482_v50  ;;  %v551_v50 = vpack.c.bf16 %v543_v49, %v543_v49 }
  0xe0   : > { %v519_v58 = vmul.f32 %v2268_v56, %v2151_v21  ;;  %1032 = vst.msk [vmem:[#allocation3 + $0x3c] sm:$0xf] %vm529_vm3, %v1024_v5 }
  0xe1   : > { %v1020_v59 = vpack.c.bf16 %v1012_v57, %v1012_v57  ;;  %v897_v57 = vpack.c.bf16 %v889_v51, %v889_v51  ;;  %v1794_v51 = vld [vmem:[%s2621_s4 + $0x10] sm:$0xff] }
  0xe2   : > { %785 = vrot.lane.b32.xlu1 %v2203_v62, %s1956_s20  ;;  %v473_v63 = vpop.f32.mrf.mxu0  ;;  %v527_v0 = vpack.c.bf16 %v519_v58, %v519_v58  ;;  %v703_v62 = vmul.f32 %v2220_v13, %v2114_v12  ;;  %v1786_v22 = vld [vmem:[#allocation3 + $0x14] sm:$0xf]  ;;  %v704_v13 = vmul.f32 %v2242_v37, %v2123_v14 }
  0xe3   : > { %1028 = vst.msk [vmem:[#allocation3 + $0x1c] sm:$0xf] %vm529_vm3, %v1020_v59  ;;  %v2279_v1 = vadd.f32 %v2160_v23, %v473_v63  ;;  %570 = vrot.lane.b32.xlu0 %v550_v8, %s1955_s27  ;;  %913 = vrot.lane.b32.xlu2 %v896_v61, %s1960_s21  ;;  %v825_v59 = vmul.f32 %v2240_v35, %v2264_v52 }
  0xe4   : > { %536 = vst.msk [vmem:[#allocation3 + $0x30] sm:$0xf] %vm529_vm3, %v527_v0  ;;  %v711_v19 = vpack.c.bf16 %v703_v62, %v703_v62  ;;  %v639_v52 = vmul.f32 %v2240_v35, %v2283_v2  ;;  %v948_v0 = vld [vmem:[#allocation2 + $0x38] sm:$0xff]  ;;  %v712_v6 = vpack.c.bf16 %v704_v13, %v704_v13 }
  0xe5   : > { %v483_v3 = vmax.f32 %v2279_v1, 0.0  ;;  %v833_v63 = vpack.c.bf16 %v825_v59, %v825_v59 }
  0xe6   : > { %v2291_v7 = vld [vmem:[#allocation2 + $0x39] sm:$0xff] }
  0xe7   : > { %v2293_v23 = vld [vmem:[#allocation2 + $0x3f] sm:$0xff]  ;;  %v1013_v9 = vmul.f32 %v2291_v7, %v2283_v2  ;;  %496 = vst.msk [vmem:[#allocation2 + $0x48] sm:$0xff] %vm484_vm2, %v483_v3  ;;  %v641_v5 = vmul.f32 %v2291_v7, %v2314_v39 }
  0xe8   : > { %v520_v15 = vmul.f32 %v2293_v23, %v2131_v16  ;;  %v1707_v62 = vld [vmem:[#allocation3 + $0x38] sm:$0xf0] }
  0xe9   : > { %v1021_v18 = vpack.c.bf16 %v1013_v9, %v1013_v9  ;;  %v647_v9 = vpack.c.bf16 %v639_v52, %v639_v52 }
  0xea   : > { %972 = vrot.lane.b32.xlu1 %v550_v8, %s2633_s22  ;;  %v1691_v26 = vld [vmem:[#allocation3 + $0x18] sm:$0xf0]  ;;  %v528_v60 = vpack.c.bf16 %v520_v15, %v520_v15 }
  0xeb   : > { %1029 = vst.msk [vmem:[#allocation3 + $0x24] sm:$0xf] %vm529_vm3, %v1021_v18  ;;  %730 = vrot.lane.b32.xlu0 %v711_v19, %s1958_s12  ;;  %728 = vrot.lane.b32.xlu2 %v710_v20, %s1958_s12  ;;  %v1694_v30 = vor.u32 %v1786_v22, %v1691_v26  ;;  %v640_v18 = vmul.f32 %v2266_v53, %v2306_v33  ;;  %v545_v19 = vld [vmem:[#allocation2 + $0x40] sm:$0xff] }
  0xec   : > { %537 = vst.msk [vmem:[#allocation3 + $0x38] sm:$0xf] %vm529_vm3, %v528_v60  ;;  %v705_v22 = vmul.f32 %v2268_v56, %v2141_v17  ;;  %v553_v60 = vpack.c.bf16 %v545_v19, %v545_v19 }
  0xed   : > { %1748 = vmatmul.msk.bf16.gmra.mxu2 %vm484_vm2, %v1694_v30  ;;  %v648_v35 = vpack.c.bf16 %v640_v18, %v640_v18 }
  0xee   : > { %v2312_v38 = vld [vmem:[#allocation2 + $0x41] sm:$0xff]  ;;  %v1007_v40 = vld [vmem:[#allocation2 + $0x49] sm:$0xff]  ;;  %v713_v30 = vpack.c.bf16 %v705_v22, %v705_v22 }
  0xef   : > { %v1014_v42 = vmul.f32 %v2312_v38, %v2306_v33  ;;  %v1015_v44 = vmul.f32 %v1007_v40, %v2314_v39  ;;  %v2320_v45 = vmul.f32 %v2312_v38, %v626_v31  ;;  %v2322_v46 = vmul.f32 %v1007_v40, %v626_v31 }
  0xf0   : > { %v827_v31 = vmul.f32 %v2291_v7, %v2306_v33  ;;  %v706_v33 = vmul.f32 %v2293_v23, %v2151_v21 }
  0xf1   : > { %v1022_v10 = vpack.c.bf16 %v1014_v42, %v1014_v42  ;;  %v1023_v47 = vpack.c.bf16 %v1015_v44, %v1015_v44  ;;  %v649_v42 = vpack.c.bf16 %v641_v5, %v641_v5  ;;  %v1795_v44 = vld [vmem:[%s2621_s4 + $0x18] sm:$0xff] }
  0xf2   : > { %665 = vrot.lane.b32.xlu1 %v646_v43, %s1957_s11  ;;  %v1788_v54 = vld [vmem:[#allocation3 + $0x24] sm:$0xf]  ;;  %v835_v36 = vpack.c.bf16 %v827_v31, %v827_v31  ;;  %v714_v7 = vpack.c.bf16 %v706_v33, %v706_v33 }
  0xf3   : > { %1030 = vst.msk [vmem:[#allocation3 + $0x2c] sm:$0xf] %vm529_vm3, %v1022_v10  ;;  %850 = vrot.lane.b32.xlu0 %v832_v24, %s1959_s18  ;;  %787 = vrot.lane.b32.xlu2 %v550_v8, %s1956_s20  ;;  %v890_v8 = vmul.f32 %v2242_v37, %v2114_v12  ;;  %v956_v12 = vpack.c.bf16 %v948_v0, %v948_v0  ;;  %v699_v43 = vld [vmem:[#allocation2 + $0x47] sm:$0xff] }
  0xf4   : > { %1031 = vst.msk [vmem:[#allocation3 + $0x34] sm:$0xf] %vm529_vm3, %v1023_v47  ;;  %v891_v37 = vmul.f32 %v2268_v56, %v2123_v14  ;;  %v1798_v14 = vld [vmem:[%s2621_s4 + $0x30] sm:$0xff]  ;;  %v826_v56 = vmul.f32 %v2266_v53, %v2283_v2  ;;  %v1796_v53 = vld [vmem:[%s2621_s4 + $0x20] sm:$0xff]  ;;  %v707_v24 = vmul.f32 %v699_v43, %v2131_v16  ;;  %v893_v13 = vmul.f32 %v699_v43, %v2151_v21 }
  0xf5   : > { %v898_v11 = vpack.c.bf16 %v890_v8, %v890_v8  ;;  %1166 = vmatpush.bf16.msra.mxu1 %v1798_v14  ;;  %v1792_v8 = vld [vmem:[%s2621_s4] sm:$0xff]  ;;  %v650_v0 = vpack.c.bf16 %v2320_v45, %v2320_v45  ;;  %v837_v45 = vpack.c.bf16 %v2322_v46, %v2322_v46 }
  0xf6   : > { %v899_v26 = vpack.c.bf16 %v891_v37, %v891_v37  ;;  %v834_v40 = vpack.c.bf16 %v826_v56, %v826_v56  ;;  %v901_v52 = vpack.c.bf16 %v893_v13, %v893_v13 }
  0xf9   : > { %1167 = vmatpush.bf16.msra.mxu1 %v1797_v34 }
  0xfa   : > { %572 = vrot.lane.b32.xlu1 %v551_v50, %s1955_s27  ;;  %v1699_v58 = vld [vmem:[#allocation3 + $0x28] sm:$0xf0] }
  0xfb   : > { %789 = vrot.lane.b32.xlu0 %v551_v50, %s1956_s20  ;;  %915 = vrot.lane.b32.xlu2 %v897_v57, %s1960_s21  ;;  %v1702_v61 = vor.u32 %v1788_v54, %v1699_v58  ;;  %v1790_v3 = vld [vmem:[#allocation3 + $0x34] sm:$0xf]  ;;  %v764_v54 = vld [vmem:[#allocation2 + $0x48] sm:$0xff]  ;;  %v715_v57 = vpack.c.bf16 %v707_v24, %v707_v24 }
  0xfc   : > { %v1710_v15 = vor.u32 %v1790_v3, %v1707_v62  ;;  %v1793_v58 = vld [vmem:[%s2621_s4 + $0x8] sm:$0xff]  ;;  %v772_v59 = vpack.c.bf16 %v764_v54, %v764_v54  ;;  %v951_v62 = vld [vmem:[#allocation2 + $0x50] sm:$0xff] }
  0xfd   : > { %1749 = vmatmul.msk.bf16.vlgmr.msra.gmra.mxu3 %vm484_vm2, %v1702_v61  ;;  %1168 = vmatpush.bf16.msra.mxu1 %v1796_v53 }
 0x101   : > { %1169 = vmatpush.bf16.msra.mxu1 %v1795_v44 }
 0x102   : > { %852 = vrot.lane.b32.xlu1 %v833_v63, %s1959_s18 }
 0x103   : > { %917 = vrot.lane.b32.xlu0 %v898_v11, %s1960_s21  ;;  %974 = vrot.lane.b32.xlu2 %v551_v50, %s2633_s22  ;;  %v892_v50 = vmul.f32 %v2293_v23, %v2141_v17  ;;  %v828_v17 = vmul.f32 %v2312_v38, %v2314_v39  ;;  %v886_v39 = vld [vmem:[#allocation2 + $0x4f] sm:$0xff] }
 0x104   : > { %v894_v3 = vmul.f32 %v886_v39, %v2131_v16 }
 0x105   : > { %1170 = vmatpush.bf16.msra.mxu1 %v1794_v51  ;;  %v900_v61 = vpack.c.bf16 %v892_v50, %v892_v50  ;;  %v836_v38 = vpack.c.bf16 %v828_v17, %v828_v17 }
 0x109   : > { %1171 = vmatpush.bf16.msra.mxu1 %v1793_v58 }
 0x10a   : > { %732 = vrot.lane.b32.xlu1 %v712_v6, %s1958_s12 }
 0x10b   : > { %976 = vrot.lane.b32.xlu0 %v956_v12, %s2633_s22  ;;  %667 = vrot.lane.b32.xlu2 %v647_v9, %s1957_s11  ;;  %v902_v9 = vpack.c.bf16 %v894_v3, %v894_v3 }
 0x10d   : > { %1750 = vmatmul.msk.bf16.gmra.mxu3 %vm484_vm2, %v1710_v15  ;;  %1172 = vmatpush.bf16.msra.mxu1 %v1792_v8  ;;  %v959_v15 = vpack.c.bf16 %v951_v62, %v951_v62  ;;  %v1854_v62 = vld [vmem:[%s2622_s5] ss:$0 sm:$0xff] }
 0x112   : > { %791 = vrot.lane.b32.xlu1 %v956_v12, %s1956_s20 }
 0x113   : > { %669 = vrot.lane.b32.xlu0 %v648_v35, %s1957_s11  ;;  %574 = vrot.lane.b32.xlu2 %v956_v12, %s1955_s27 }
 0x115   : > { %v660_v20 = vpop.permute.xlu2 %659 }
 0x116   : > { %684 = vst.msk [vmem:[#allocation3] sm:$0xf] %vm683_vm5, %v660_v20 }
 0x11a   : > { %919 = vrot.lane.b32.xlu1 %v899_v26, %s1960_s21 }
 0x11b   : > { %576 = vrot.lane.b32.xlu0 %v553_v60, %s1955_s27  ;;  %734 = vrot.lane.b32.xlu2 %v713_v30, %s1958_s12 }
 0x11d   : > { %v2374_v32 = vpop.permute.xlu2 %968 }
 0x122   : > { %978 = vrot.lane.b32.xlu1 %v553_v60, %s2633_s22 }
 0x123   : > { %856 = vrot.lane.b32.xlu0 %v835_v36, %s1959_s18  ;;  %854 = vrot.lane.b32.xlu2 %v834_v40, %s1959_s18 }
 0x125   : > { %v727_v2 = vpop.permute.xlu2 %726 }
 0x12a   : > { %671 = vrot.lane.b32.xlu1 %v649_v42, %s1957_s11 }
 0x12b   : > { %736 = vrot.lane.b32.xlu0 %v714_v7, %s1958_s12  ;;  %793 = vrot.lane.b32.xlu2 %v553_v60, %s1956_s20 }
 0x12c   : > { %v565_v10 = vpop.permute.xlu1 %564  ;;  %v782_v47 = vpop.permute.xlu0 %781 }
 0x12d   : > { %588 = vst.msk [vmem:[#allocation3 + $0x8] sm:$0xf] %vm586_vm4, %v565_v10  ;;  %v847_v49 = vpop.permute.xlu2 %846 }
 0x132   : > { %738 = vrot.lane.b32.xlu1 %v715_v57, %s1958_s12 }
 0x133   : > { %795 = vrot.lane.b32.xlu0 %v772_v59, %s1956_s20  ;;  %921 = vrot.lane.b32.xlu2 %v900_v61, %s1960_s21  ;;  %s1802_s20 = sshll.u32 %s2039_s17, 6 }
 0x134   : > { %v725_v23 = vpop.permute.xlu1 %724 }
 0x135   : > { %749 = vst.msk [vmem:[#allocation3] sm:$0xf] %vm748_vm6, %v725_v23  ;;  %v662_v63 = vpop.permute.xlu0 %661  ;;  %v569_v11 = vpop.permute.xlu2 %568 }
 0x136   : > { %806 = vst.msk [vmem:[#allocation3] sm:$0xf] %vm805_vm7, %v782_v47 }
 0x137   : > { %685 = vst.msk [vmem:[#allocation3 + $0x8] sm:$0xf] %vm683_vm5, %v662_v63 }
 0x138   : > { %750 = vst.msk [vmem:[#allocation3 + $0x8] sm:$0xf] %vm748_vm6, %v727_v2 }
 0x139   : > { %590 = vst.msk [vmem:[#allocation3 + $0x18] sm:$0xf] %vm586_vm4, %v569_v11 }
 0x13a   : > { %858 = vrot.lane.b32.xlu1 %v836_v38, %s1959_s18  ;;  %871 = vst.msk [vmem:[#allocation3] sm:$0xf] %vm870_vm8, %v847_v49 }
 0x13b   : > { %923 = vrot.lane.b32.xlu0 %v901_v52, %s1960_s21  ;;  %673 = vrot.lane.b32.xlu2 %v650_v0, %s1957_s11  ;;  %v1801_v0 = vld [vmem:[%s2623_s6] sm:$0xff] }
 0x13c   : > { %v784_v21 = vpop.permute.xlu1 %783  ;;  %1258 = vmatpush.bf16.msrb.mxu3 %v1801_v0 }
 0x13d   : > { %807 = vst.msk [vmem:[#allocation3 + $0x8] sm:$0xf] %vm805_vm7, %v784_v21  ;;  %v971_v6 = vpop.permute.xlu0 %970  ;;  %v914_v12 = vpop.permute.xlu2 %913 }
 0x142   : > { %925 = vrot.lane.b32.xlu1 %v902_v9, %s1960_s21 }
 0x143   : > { %982 = vrot.lane.b32.xlu0 %v959_v15, %s2633_s22  ;;  %860 = vrot.lane.b32.xlu2 %v837_v45, %s1959_s18  ;;  %s1570_s18 = scalar_lea.hbm %s2627_s10, %s1802_s20  ;;  %s1909_s20 = scalar_lea.hbm %s2627_s10, 128 }
 0x144   : > { %v567_v18 = vpop.permute.xlu1 %566  ;;  %s1573_s21 = sshll.u32 %s1570_s18, 4  ;;  %s1574_s21 = int_to_ptr.hbm [resolvable:$true] %s1573_s21 }
 0x145   : > { %589 = vst.msk [vmem:[#allocation3 + $0x10] sm:$0xf] %vm586_vm4, %v567_v18  ;;  %v849_v16 = vpop.permute.xlu0 %848  ;;  %v729_v35 = vpop.permute.xlu2 %728  ;;  %s1903_s25 = sshra.s32 %s1574_s21, 4  ;;  %s1904_s25 = int_to_ptr.hbm [resolvable:$true] %s1903_s25 }
 0x146   : > { %872 = vst.msk [vmem:[#allocation3 + $0x8] sm:$0xf] %vm870_vm8, %v849_v16  ;;  %s1905_s27 = scalar_lea.hbm %s1904_s25, 64  ;;  %p1910_p0 = scmp.lt.s32.totalorder %s1904_s25, %s2627_s10 }
 0x147   : > { %937 = vst.msk [vmem:[#allocation3 + $0x8] sm:$0xf] %vm935_vm9, %v914_v12  ;;  %p1906_p11 = scmp.ne.s32.totalorder %s1904_s25, %s1905_s27  ;;  %p1911_p1 = scmp.lt.s32.totalorder %s1909_s20, %s1905_s27 }
 0x148   : > { %994 = vst.msk [vmem:[#allocation3 + $0x8] sm:$0xf] %vm992_vm10, %v971_v6 }
 0x149   : > { %p1907_p12 = pnand %p1906_p11, %p2056_p5  ;;  %p1912_p2 = por %p1911_p1, %p1910_p0 }
 0x14a   : > { %1510 = vrot.lane.b32.xlu1 %v2163_v25, %s2633_s22 }
 0x14b   : > { %1514 = vrot.lane.b32.xlu0 %v2182_v41, %s2633_s22  ;;  %980 = vrot.lane.b32.xlu2 %v772_v59, %s2633_s22  ;;  %p1908_p13 = pneg %p1907_p12 }
 0x14c   : > { %v912_v46 = vpop.permute.xlu1 %911 }
 0x14d   : > { %936 = vst.msk [vmem:[#allocation3] sm:$0xf] %vm935_vm9, %v912_v46  ;;  %v664_v37 = vpop.permute.xlu0 %663  ;;  %v788_v19 = vpop.permute.xlu2 %787  ;;  %p1913_p3 = pnand %p1912_p2, %p1908_p13 }
 0x14e   : > { %993 = vst.msk [vmem:[#allocation3] sm:$0xf] %vm992_vm10, %v2374_v32 }
 0x14f   : > { %686 = vst.msk [vmem:[#allocation3 + $0x10] sm:$0xf] %vm683_vm5, %v664_v37  ;;  %v1785_v20 = vld [vmem:[#allocation3 + $0x4] sm:$0xf0] }
 0x150   : > { %751 = vst.msk [vmem:[#allocation3 + $0x10] sm:$0xf] %vm748_vm6, %v729_v35 }
 0x152   : > { %1516 = vrot.lane.b32.xlu1 %v2192_v55, %s2633_s22 }
 0x153   : > { %1520 = vrot.lane.b32.xlu0 %v2230_v28, %s2633_s22  ;;  %1512 = vrot.lane.b32.xlu2 %v2170_v29, %s2633_s22 }
 0x154   : > { %v786_v25 = vpop.permute.xlu1 %785 }
 0x155   : > { %808 = vst.msk [vmem:[#allocation3 + $0x10] sm:$0xf] %vm805_vm7, %v786_v25  ;;  %v1681_v41 = vld [vmem:[#allocation3] sm:$0xf]  ;;  %v571_v22 = vpop.permute.xlu0 %570  ;;  %v916_v26 = vpop.permute.xlu2 %915 }
 0x156   : > { %v1682_v60 = vor.u32 %v1785_v20, %v1681_v41  ;;  %591 = vst.msk [vmem:[#allocation3 + $0x20] sm:$0xf] %vm586_vm4, %v571_v22 }
 0x158   : > { %1173 = vmatmul.bf16.vlgmr.msra.gmra.mxu1 %v1682_v60 }
 0x15a   : > { %1522 = vrot.lane.b32.xlu1 %v2253_v48, %s2633_s22 }
 0x15b   : > { %1518 = vrot.lane.b32.xlu2 %v2209_v4, %s2633_s22 }
 0x15c   : > { %v973_v55 = vpop.permute.xlu1 %972 }
 0x15d   : > { %v731_v28 = vpop.permute.xlu0 %730  ;;  %v975_v29 = vpop.permute.xlu2 %974 }
 0x160   : > { %v1203_v21 = vpop.f32.mrf.mxu2 }
 0x163   : > { %1524 = vrot.lane.b32.xlu2 %v2279_v1, %s2633_s22  ;;  %s2552_s22 = scalar_lea.vmem [#allocation4], %s1640_s29 }
 0x164   : > { %v666_v27 = vpop.permute.xlu1 %665  ;;  %s1571_s17 = sshll.u32 %s2552_s22, 4  ;;  %s1572_s17 = int_to_ptr.vmem [resolvable:$true] %s1571_s17 }
 0x165   : > { %687 = vst.msk [vmem:[#allocation3 + $0x18] sm:$0xf] %vm683_vm5, %v666_v27  ;;  %v851_v30 = vpop.permute.xlu0 %850  ;;  %v668_v14 = vpop.permute.xlu2 %667 }
 0x166   : > { %752 = vst.msk [vmem:[#allocation3 + $0x18] sm:$0xf] %vm748_vm6, %v731_v28 }
 0x167   : > { %809 = vst.msk [vmem:[#allocation3 + $0x18] sm:$0xf] %vm805_vm7, %v788_v19 }
 0x168   : > { %873 = vst.msk [vmem:[#allocation3 + $0x10] sm:$0xf] %vm870_vm8, %v851_v30  ;;  %v1205_v15 = vpop.f32.mrf.mxu2 }
 0x169   : > { %938 = vst.msk [vmem:[#allocation3 + $0x10] sm:$0xf] %vm935_vm9, %v916_v26 }
 0x16a   : > { %995 = vst.msk [vmem:[#allocation3 + $0x10] sm:$0xf] %vm992_vm10, %v973_v55 }
 0x16b   : > { %688 = vst.msk [vmem:[#allocation3 + $0x20] sm:$0xf] %vm683_vm5, %v668_v14 }
 0x16c   : > { %v573_v4 = vpop.permute.xlu1 %572 }
 0x16d   : > { %592 = vst.msk [vmem:[#allocation3 + $0x28] sm:$0xf] %vm586_vm4, %v573_v4  ;;  %v790_v48 = vpop.permute.xlu0 %789  ;;  %v575_v1 = vpop.permute.xlu2 %574 }
 0x16e   : > { %593 = vst.msk [vmem:[#allocation3 + $0x30] sm:$0xf] %vm586_vm4, %v575_v1 }
 0x170   : > { %v1208_v35 = vpop.f32.mrf.mxu2 }
 0x171   : > { %v1689_v5 = vld [vmem:[#allocation3 + $0x10] sm:$0xf] }
 0x174   : > { %v853_v56 = vpop.permute.xlu1 %852 }
 0x175   : > { %874 = vst.msk [vmem:[#allocation3 + $0x18] sm:$0xf] %vm870_vm8, %v853_v56  ;;  %v918_v31 = vpop.permute.xlu0 %917  ;;  %v735_v32 = vpop.permute.xlu2 %734 }
 0x176   : > { %939 = vst.msk [vmem:[#allocation3 + $0x18] sm:$0xf] %vm935_vm9, %v918_v31 }
 0x177   : > { %996 = vst.msk [vmem:[#allocation3 + $0x18] sm:$0xf] %vm992_vm10, %v975_v29 }
 0x178   : > { %v1210_v41 = vpop.f32.mrf.mxu2 }
 0x17c   : > { %v733_v34 = vpop.permute.xlu1 %732 }
 0x17d   : > { %753 = vst.msk [vmem:[#allocation3 + $0x20] sm:$0xf] %vm748_vm6, %v733_v34  ;;  %v977_v36 = vpop.permute.xlu0 %976  ;;  %v855_v40 = vpop.permute.xlu2 %854 }
 0x17e   : > { %810 = vst.msk [vmem:[#allocation3 + $0x20] sm:$0xf] %vm805_vm7, %v790_v48  ;;  %v1787_v53 = vld [vmem:[#allocation3 + $0x14] sm:$0xf0] }
 0x17f   : > { %875 = vst.msk [vmem:[#allocation3 + $0x20] sm:$0xf] %vm870_vm8, %v855_v40  ;;  %v1690_v2 = vor.u32 %v1787_v53, %v1689_v5 }
 0x180   : > { %v1213_v60 = vpop.f32.mrf.mxu3 }
 0x181   : > { %1178 = vmatmul.bf16.gmra.mxu1 %v1690_v2  ;;  %v1292_v2 = vld [vmem:[%s2625_s8] sm:$0xf] }
 0x184   : > { %v792_v33 = vpop.permute.xlu1 %791 }
 0x185   : > { %v670_v42 = vpop.permute.xlu0 %669  ;;  %v794_v43 = vpop.permute.xlu2 %793 }
 0x186   : > { %689 = vst.msk [vmem:[#allocation3 + $0x28] sm:$0xf] %vm683_vm5, %v670_v42 }
 0x187   : > { %754 = vst.msk [vmem:[#allocation3 + $0x28] sm:$0xf] %vm748_vm6, %v735_v32 }
 0x188   : > { %811 = vst.msk [vmem:[#allocation3 + $0x28] sm:$0xf] %vm805_vm7, %v792_v33  ;;  %v1215_v30 = vpop.f32.mrf.mxu3  ;;  %v1311_v33 = vsel %vm443_vm0, %v1292_v2, 0 }
 0x189   : > { %1320 = vmatpush.bf16.msrb.mxu2 %v1311_v33 }
 0x18c   : > { %v920_v44 = vpop.permute.xlu1 %919 }
 0x18d   : > { %940 = vst.msk [vmem:[#allocation3 + $0x20] sm:$0xf] %vm935_vm9, %v920_v44  ;;  %v577_v7 = vpop.permute.xlu0 %576  ;;  %v922_v10 = vpop.permute.xlu2 %921 }
 0x18e   : > { %997 = vst.msk [vmem:[#allocation3 + $0x20] sm:$0xf] %vm992_vm10, %v977_v36 }
 0x18f   : > { %594 = vst.msk [vmem:[#allocation3 + $0x38] sm:$0xf] %vm586_vm4, %v577_v7 }
 0x190   : > { %v1218_v1 = vpop.f32.mrf.mxu3 }
 0x194   : > { %v979_v24 = vpop.permute.xlu1 %978 }
 0x195   : > { %v857_v47 = vpop.permute.xlu0 %856  ;;  %v674_v49 = vpop.permute.xlu2 %673  ;;  %v1697_v54 = vld [vmem:[#allocation3 + $0x20] sm:$0xf] }
 0x196   : > { %876 = vst.msk [vmem:[#allocation3 + $0x28] sm:$0xf] %vm870_vm8, %v857_v47 }
 0x197   : > { %941 = vst.msk [vmem:[#allocation3 + $0x28] sm:$0xf] %vm935_vm9, %v922_v10 }
 0x198   : > { %998 = vst.msk [vmem:[#allocation3 + $0x28] sm:$0xf] %vm992_vm10, %v979_v24  ;;  %v1220_v36 = vpop.f32.mrf.mxu3 }
 0x199   : > { %691 = vst.msk [vmem:[#allocation3 + $0x38] sm:$0xf] %vm683_vm5, %v674_v49 }
 0x19c   : > { %v672_v50 = vpop.permute.xlu1 %671 }
 0x19d   : > { %690 = vst.msk [vmem:[#allocation3 + $0x30] sm:$0xf] %vm683_vm5, %v672_v50  ;;  %v737_v51 = vpop.permute.xlu0 %736  ;;  %v861_v61 = vpop.permute.xlu2 %860 }
 0x19e   : > { %755 = vst.msk [vmem:[#allocation3 + $0x30] sm:$0xf] %vm748_vm6, %v737_v51 }
 0x19f   : > { %812 = vst.msk [vmem:[#allocation3 + $0x30] sm:$0xf] %vm805_vm7, %v794_v43  ;;  %v1789_v57 = vld [vmem:[#allocation3 + $0x24] sm:$0xf0]  ;;  %v1855_v43 = vld [vmem:[%s2624_s7] ss:$0 sm:$0xff] }
 0x1a0   : > { %v1698_v58 = vor.u32 %v1789_v57, %v1697_v54 }
 0x1a2   : > { %1183 = vmatmul.bf16.gmra.mxu1 %v1698_v58 }
 0x1a4   : > { %v739_v59 = vpop.permute.xlu1 %738 }
 0x1a5   : > { %756 = vst.msk [vmem:[#allocation3 + $0x38] sm:$0xf] %vm748_vm6, %v739_v59  ;;  %v796_v17 = vpop.permute.xlu0 %795  ;;  %v981_v63 = vpop.permute.xlu2 %980 }
 0x1a6   : > { %813 = vst.msk [vmem:[#allocation3 + $0x38] sm:$0xf] %vm805_vm7, %v796_v17 }
 0x1a7   : > { %878 = vst.msk [vmem:[#allocation3 + $0x38] sm:$0xf] %vm870_vm8, %v861_v61 }
 0x1ac   : > { %v859_v23 = vpop.permute.xlu1 %858 }
 0x1ad   : > { %877 = vst.msk [vmem:[#allocation3 + $0x30] sm:$0xf] %vm870_vm8, %v859_v23  ;;  %v924_v8 = vpop.permute.xlu0 %923 }
 0x1ae   : > { %942 = vst.msk [vmem:[#allocation3 + $0x30] sm:$0xf] %vm935_vm9, %v924_v8 }
 0x1af   : > { %999 = vst.msk [vmem:[#allocation3 + $0x30] sm:$0xf] %vm992_vm10, %v981_v63 }
 0x1b4   : > { %v926_v11 = vpop.permute.xlu1 %925 }
 0x1b5   : > { %943 = vst.msk [vmem:[#allocation3 + $0x38] sm:$0xf] %vm935_vm9, %v926_v11  ;;  %v983_v13 = vpop.permute.xlu0 %982 }
 0x1b6   : > { %1000 = vst.msk [vmem:[#allocation3 + $0x38] sm:$0xf] %vm992_vm10, %v983_v13  ;;  %v1705_v38 = vld [vmem:[#allocation3 + $0x30] sm:$0xf] }
 0x1bc   : > { %v1511_v2 = vpop.permute.xlu1 %1510 }
 0x1bd   : > { %v1791_v39 = vld [vmem:[#allocation3 + $0x34] sm:$0xf0] }
 0x1be   : > { %v1706_v52 = vor.u32 %v1791_v39, %v1705_v38 }
 0x1c0   : > { %1188 = vmatmul.bf16.gmra.mxu1 %v1706_v52 }
 0x1d5   : > { %v1174_v3 = vpop.f32.mrf.mxu1 }
 0x1d6   : > { %v1175_v6 = vadd.f32 %v1854_v62, %v1174_v3 }
 0x1d8   : > { %v2502_v45 = vadd.f32 %v1203_v21, %v1175_v6 }
 0x1dd   : > { %v1176_v12 = vpop.f32.mrf.mxu1 }
 0x1de   : > { %v1177_v9 = vadd.f32 %v1854_v62, %v1176_v12  ;;  %v2544_v12 = vld [vmem:[%s2626_s9] ss:$0 sm:$0xff] }
 0x1e0   : > { %v2504_v18 = vadd.f32 %v1205_v15, %v1177_v9 }
 0x1e2   : > { %v1223_v16 = vpack.c.bf16 %v2504_v18, %v2502_v45 }
 0x1e4   : > { %1755 = vmatmul.msk.bf16.vlgmr.msrb.gmra.mxu3 %vm484_vm2, %v1223_v16 }
 0x1fe   : > { %v1179_v46 = vpop.f32.mrf.mxu1 }
 0x1ff   : > { %v1180_v37 = vadd.f32 %v1854_v62, %v1179_v46 }
 0x201   : > { %v2509_v20 = vadd.f32 %v1208_v35, %v1180_v37 }
 0x206   : > { %v1181_v19 = vpop.f32.mrf.mxu1 }
 0x207   : > { %v1182_v25 = vadd.f32 %v1854_v62, %v1181_v19 }
 0x209   : > { %v2511_v22 = vadd.f32 %v1210_v41, %v1182_v25 }
 0x20b   : > { %v1224_v26 = vpack.c.bf16 %v2511_v22, %v2509_v20 }
 0x20d   : > { %1756 = vmatmul.msk.bf16.gmra.mxu3 %vm484_vm2, %v1224_v26 }
 0x21f   : > { %v1184_v55 = vpop.f32.mrf.mxu1 }
 0x220   : > { %v1185_v28 = vadd.f32 %v1854_v62, %v1184_v55 }
 0x222   : > { %v2516_v14 = vadd.f32 %v1213_v60, %v1185_v28 }
 0x227   : > { %v1186_v29 = vpop.f32.mrf.mxu1 }
 0x228   : > { %v1187_v27 = vadd.f32 %v1854_v62, %v1186_v29 }
 0x22a   : > { %v2518_v4 = vadd.f32 %v1215_v30, %v1187_v27 }
 0x22c   : > { %v1225_v48 = vpack.c.bf16 %v2518_v4, %v2516_v14 }
 0x22e   : > { %1757 = vmatmul.msk.bf16.gmra.mxu3 %vm484_vm2, %v1225_v48 }
 0x23d   : > { %v1189_v56 = vpop.f32.mrf.mxu1 }
 0x23e   : > { %v1190_v31 = vadd.f32 %v1854_v62, %v1189_v56 }
 0x240   : > { %v2523_v40 = vadd.f32 %v1218_v1, %v1190_v31 }
 0x245   : > { %v1191_v32 = vpop.f32.mrf.mxu1 }
 0x246   : > { %v1192_v34 = vadd.f32 %v1854_v62, %v1191_v32 }
 0x248   : > { %v2525_v5 = vadd.f32 %v1220_v36, %v1192_v34 }
 0x24a   : > { %v1226_v53 = vpack.c.bf16 %v2525_v5, %v2523_v40 }
 0x24c   : > { %1758 = vmatmul.msk.bf16.gmra.mxu3 %vm484_vm2, %v1226_v53 }
 0x267   : > { %v1260_v42 = vpop.f32.mrf.mxu3 }
 0x268   : > { %v1261_v44 = vadd.f32 %v1855_v43, %v1260_v42 }
 0x26a   : > { %v1280_v24 = vmax.f32 %v1261_v44, 0.0 }
 0x26f   : > { %v1262_v7 = vpop.f32.mrf.mxu3 }
 0x270   : > { %v1263_v10 = vadd.f32 %v1855_v43, %v1262_v7 }
 0x272   : > { %v1281_v47 = vmax.f32 %v1263_v10, 0.0 }
 0x274   : > { %v1288_v49 = vpack.c.bf16 %v1281_v47, %v1280_v24 }
 0x276   : > { %1759 = vmatmul.msk.bf16.vlgmr.msrb.gmra.mxu2 %vm1297_vm11, %v1288_v49 }
 0x290   : > { %v1265_v50 = vpop.f32.mrf.mxu3 }
 0x291   : > { %v1266_v51 = vadd.f32 %v1855_v43, %v1265_v50  ;;  %v1513_v50 = vpop.permute.xlu2 %1512 }
 0x293   : > { %v1282_v58 = vmax.f32 %v1266_v51, 0.0 }
 0x298   : > { %v1267_v54 = vpop.f32.mrf.mxu3 }
 0x299   : > { %v1268_v57 = vadd.f32 %v1855_v43, %v1267_v54 }
 0x29b   : > { %v1283_v59 = vmax.f32 %v1268_v57, 0.0 }
 0x29d   : > { %v1289_v61 = vpack.c.bf16 %v1283_v59, %v1282_v58 }
 0x29f   : > { %1760 = vmatmul.msk.bf16.gmra.mxu2 %vm1297_vm11, %v1289_v61 }
 0x2b1   : > { %v1270_v17 = vpop.f32.mrf.mxu3 }
 0x2b2   : > { %v1271_v23 = vadd.f32 %v1855_v43, %v1270_v17 }
 0x2b4   : > { %v1284_v11 = vmax.f32 %v1271_v23, 0.0 }
 0x2b9   : > { %v1272_v8 = vpop.f32.mrf.mxu3 }
 0x2ba   : > { %v1273_v63 = vadd.f32 %v1855_v43, %v1272_v8 }
 0x2bc   : > { %v1285_v13 = vmax.f32 %v1273_v63, 0.0 }
 0x2be   : > { %v1290_v38 = vpack.c.bf16 %v1285_v13, %v1284_v11 }
 0x2c0   : > { %1761 = vmatmul.msk.bf16.gmra.mxu2 %vm1297_vm11, %v1290_v38 }
 0x2cf   : > { %v1275_v39 = vpop.f32.mrf.mxu3 }
 0x2d0   : > { %v1276_v52 = vadd.f32 %v1855_v43, %v1275_v39 }
 0x2d2   : > { %v1286_v3 = vmax.f32 %v1276_v52, 0.0 }
 0x2d7   : > { %v1277_v0 = vpop.f32.mrf.mxu3 }
 0x2d8   : > { %v1278_v21 = vadd.f32 %v1855_v43, %v1277_v0 }
 0x2da   : > { %v1287_v62 = vmax.f32 %v1278_v21, 0.0 }
 0x2dc   : > { %v1291_v6 = vpack.c.bf16 %v1287_v62, %v1286_v3 }
 0x2de   : > { %1762 = vmatmul.msk.bf16.gmra.mxu2 %vm1297_vm11, %v1291_v6 }
 0x2f9   : > { %v1322_v9 = vpop.f32.mrf.mxu2 }
 0x2fa   : > { %v1323_v15 = vadd.f32 %v2544_v12, %v1322_v9 }
 0x2fc   : > { %v1763_v16 = vmul.f32 -1.442695, %v1323_v15 }
 0x2fe   : > { %1857 = vpow2.f32 %v1763_v16 }
 0x301   : > { %v1324_v35 = vpop.f32.mrf.mxu2 }
 0x302   : > { %v1325_v46 = vadd.f32 %v2544_v12, %v1324_v35 }
 0x304   : > { %v1858_v37 = vpop.eup %1857  ;;  %v1764_v19 = vmul.f32 -1.442695, %v1325_v46 }
 0x305   : > { %v1366_v25 = vadd.f32 1.0, %v1858_v37  ;;  %v1515_v37 = vpop.permute.xlu0 %1514 }
 0x306   : > { %1859 = vpow2.f32 %v1764_v19 }
 0x307   : > { %1861 = vrcp.f32 %v1366_v25  ;;  %v1385_v29 = vand.u32 2147483648, %v1366_v25  ;;  %v1383_v30 = vand.u32 2147483647, %v1366_v25  ;;  %vm1379_vm13 = vweird.f32 %v1366_v25 }
 0x309   : > { %v1386_v56 = vor.u32 1.1754944e-38, %v1385_v29  ;;  %vm1384_vm15 = vcmp.eq.f32.partialorder %v1383_v30, 8.507059e+37 }
 0x30c   : > { %v1860_v41 = vpop.eup %1859 }
 0x30d   : > { %v1862_v26 = vpop.eup %1861  ;;  %v1367_v60 = vadd.f32 1.0, %v1860_v41 }
 0x30e   : > { %v1375_v55 = vmul.f32 %v1862_v26, %v1366_v25  ;;  %vm1380_vm12 = vweird.f32 %v1862_v26 }
 0x30f   : > { %1863 = vrcp.f32 %v1367_v60  ;;  %vm1381_vm14 = vmor %vm1379_vm13, %vm1380_vm12  ;;  %v1400_v33 = vand.u32 2147483648, %v1367_v60  ;;  %v1398_v44 = vand.u32 2147483647, %v1367_v60  ;;  %vm1394_vm1 = vweird.f32 %v1367_v60 }
 0x310   : > { %v1376_v28 = vsub.f32 1.0, %v1375_v55 }
 0x311   : > { %v1401_v24 = vor.u32 1.1754944e-38, %v1400_v33  ;;  %vm1399_vm4 = vcmp.eq.f32.partialorder %v1398_v44, 8.507059e+37 }
 0x312   : > { %v1377_v27 = vmul.f32 %v1862_v26, %v1376_v28 }
 0x314   : > { %v1378_v48 = vadd.f32 %v1862_v26, %v1377_v27 }
 0x315   : > { %v1864_v1 = vpop.eup %1863 }
 0x316   : > { %v1382_v31 = vsel %vm1381_vm14, %v1862_v26, %v1378_v48  ;;  %v1390_v32 = vmul.f32 %v1864_v1, %v1367_v60  ;;  %vm1395_vm0 = vweird.f32 %v1864_v1 }
 0x317   : > { %v1387_v34 = vsel %vm1384_vm15, %v1386_v56, %v1382_v31  ;;  %vm1396_vm3 = vmor %vm1394_vm1, %vm1395_vm0  ;;  %v1517_v56 = vpop.permute.xlu1 %1516 }
 0x318   : > { %v1494_v36 = vmul.f32 %v1387_v34, %v2502_v45  ;;  %v1391_v53 = vsub.f32 1.0, %v1390_v32 }
 0x31a   : > { %v1534_v42 = vadd.f32 %v1511_v2, %v1494_v36  ;;  %v1392_v43 = vmul.f32 %v1864_v1, %v1391_v53 }
 0x31c   : > { %v1542_v7 = vmax.f32 %v1534_v42, 0.0  ;;  %v1393_v10 = vadd.f32 %v1864_v1, %v1392_v43 }
 0x31e   : > { %1550 = vst.msk [vmem:[%s2552_s22] sm:$0xff] %vm484_vm2, %v1542_v7  ;;  %v1397_v47 = vsel %vm1396_vm3, %v1864_v1, %v1393_v10 }
 0x31f   : > { %v1402_v45 = vsel %vm1399_vm4, %v1401_v24, %v1397_v47 }
 0x320   : > { %v1495_v49 = vmul.f32 %v1402_v45, %v2504_v18 }
 0x322   : > { %v1535_v51 = vadd.f32 %v1513_v50, %v1495_v49  ;;  %v1327_v54 = vpop.f32.mrf.mxu2 }
 0x323   : > { %v1328_v58 = vadd.f32 %v2544_v12, %v1327_v54 }
 0x324   : > { %v1543_v57 = vmax.f32 %v1535_v51, 0.0 }
 0x325   : > { %v1765_v59 = vmul.f32 -1.442695, %v1328_v58 }
 0x326   : > { %1551 = vst.msk [vmem:[%s2552_s22 + $0x8] sm:$0xff] %vm484_vm2, %v1543_v57 }
 0x327   : > { %1865 = vpow2.f32 %v1765_v59 }
 0x32a   : > { %v1329_v61 = vpop.f32.mrf.mxu2 }
 0x32b   : > { %v1330_v17 = vadd.f32 %v2544_v12, %v1329_v61 }
 0x32d   : > { %v1866_v23 = vpop.eup %1865  ;;  %v1766_v8 = vmul.f32 -1.442695, %v1330_v17 }
 0x32e   : > { %v1368_v63 = vadd.f32 1.0, %v1866_v23  ;;  %v1519_v23 = vpop.permute.xlu2 %1518 }
 0x32f   : > { %1867 = vpow2.f32 %v1766_v8 }
 0x330   : > { %1869 = vrcp.f32 %v1368_v63  ;;  %v1415_v52 = vand.u32 2147483648, %v1368_v63  ;;  %v1413_v21 = vand.u32 2147483647, %v1368_v63  ;;  %vm1409_vm6 = vweird.f32 %v1368_v63 }
 0x332   : > { %v1416_v6 = vor.u32 1.1754944e-38, %v1415_v52  ;;  %vm1414_vm8 = vcmp.eq.f32.partialorder %v1413_v21, 8.507059e+37 }
 0x335   : > { %v1868_v11 = vpop.eup %1867 }
 0x336   : > { %v1870_v18 = vpop.eup %1869  ;;  %v1369_v13 = vadd.f32 1.0, %v1868_v11 }
 0x337   : > { %v1405_v38 = vmul.f32 %v1870_v18, %v1368_v63  ;;  %vm1410_vm5 = vweird.f32 %v1870_v18 }
 0x338   : > { %1871 = vrcp.f32 %v1369_v13  ;;  %vm1411_vm7 = vmor %vm1409_vm6, %vm1410_vm5  ;;  %v1430_v19 = vand.u32 2147483648, %v1369_v13  ;;  %v1428_v26 = vand.u32 2147483647, %v1369_v13  ;;  %vm1424_vm10 = vweird.f32 %v1369_v13 }
 0x339   : > { %v1406_v39 = vsub.f32 1.0, %v1405_v38 }
 0x33a   : > { %v1431_v27 = vor.u32 1.1754944e-38, %v1430_v19  ;;  %vm1429_vm12 = vcmp.eq.f32.partialorder %v1428_v26, 8.507059e+37 }
 0x33b   : > { %v1407_v0 = vmul.f32 %v1870_v18, %v1406_v39 }
 0x33d   : > { %v1408_v3 = vadd.f32 %v1870_v18, %v1407_v0 }
 0x33e   : > { %v1872_v62 = vpop.eup %1871 }
 0x33f   : > { %v1412_v9 = vsel %vm1411_vm7, %v1870_v18, %v1408_v3  ;;  %v1420_v15 = vmul.f32 %v1872_v62, %v1369_v13  ;;  %vm1425_vm9 = vweird.f32 %v1872_v62 }
 0x340   : > { %v1417_v16 = vsel %vm1414_vm8, %v1416_v6, %v1412_v9  ;;  %vm1426_vm11 = vmor %vm1424_vm10, %vm1425_vm9  ;;  %v1521_v6 = vpop.permute.xlu0 %1520 }
 0x341   : > { %v1496_v35 = vmul.f32 %v1417_v16, %v2509_v20  ;;  %v1421_v46 = vsub.f32 1.0, %v1420_v15 }
 0x343   : > { %v1536_v25 = vadd.f32 %v1515_v37, %v1496_v35  ;;  %v1422_v41 = vmul.f32 %v1872_v62, %v1421_v46  ;;  %v1332_v60 = vpop.f32.mrf.mxu2 }
 0x344   : > { %v1333_v55 = vadd.f32 %v2544_v12, %v1332_v60 }
 0x345   : > { %v1544_v28 = vmax.f32 %v1536_v25, 0.0  ;;  %v1423_v29 = vadd.f32 %v1872_v62, %v1422_v41 }
 0x346   : > { %v1767_v30 = vmul.f32 -1.442695, %v1333_v55 }
 0x347   : > { %1552 = vst.msk [vmem:[%s2552_s22 + $0x10] sm:$0xff] %vm484_vm2, %v1544_v28  ;;  %v1427_v20 = vsel %vm1426_vm11, %v1872_v62, %v1423_v29 }
 0x348   : > { %v1432_v48 = vsel %vm1429_vm12, %v1431_v27, %v1427_v20  ;;  %1873 = vpow2.f32 %v1767_v30 }
 0x349   : > { %v1497_v1 = vmul.f32 %v1432_v48, %v2511_v22 }
 0x34b   : > { %v1537_v31 = vadd.f32 %v1517_v56, %v1497_v1  ;;  %v1334_v32 = vpop.f32.mrf.mxu2  ;;  %v1523_v56 = vpop.permute.xlu1 %1522 }
 0x34c   : > { %v1335_v34 = vadd.f32 %v2544_v12, %v1334_v32 }
 0x34d   : > { %v1545_v36 = vmax.f32 %v1537_v31, 0.0 }
 0x34e   : > { %v1874_v53 = vpop.eup %1873  ;;  %v1768_v2 = vmul.f32 -1.442695, %v1335_v34 }
 0x34f   : > { %1553 = vst.msk [vmem:[%s2552_s22 + $0x18] sm:$0xff] %vm484_vm2, %v1545_v36  ;;  %v1370_v33 = vadd.f32 1.0, %v1874_v53 }
 0x350   : > { %1875 = vpow2.f32 %v1768_v2 }
 0x351   : > { %1877 = vrcp.f32 %v1370_v33  ;;  %v1445_v22 = vand.u32 2147483648, %v1370_v33  ;;  %v1443_v47 = vand.u32 2147483647, %v1370_v33  ;;  %vm1439_vm14 = vweird.f32 %v1370_v33 }
 0x353   : > { %v1446_v50 = vor.u32 1.1754944e-38, %v1445_v22  ;;  %vm1444_vm0 = vcmp.eq.f32.partialorder %v1443_v47, 8.507059e+37 }
 0x356   : > { %v1876_v42 = vpop.eup %1875 }
 0x357   : > { %v1878_v43 = vpop.eup %1877  ;;  %v1371_v44 = vadd.f32 1.0, %v1876_v42 }
 0x358   : > { %v1435_v7 = vmul.f32 %v1878_v43, %v1370_v33  ;;  %vm1440_vm13 = vweird.f32 %v1878_v43 }
 0x359   : > { %1879 = vrcp.f32 %v1371_v44  ;;  %vm1441_vm15 = vmor %vm1439_vm14, %vm1440_vm13  ;;  %v1458_v8 = vand.u32 2147483647, %v1371_v44  ;;  %v1460_v63 = vand.u32 2147483648, %v1371_v44  ;;  %vm1454_vm3 = vweird.f32 %v1371_v44 }
 0x35a   : > { %v1436_v10 = vsub.f32 1.0, %v1435_v7 }
 0x35b   : > { %v1461_v52 = vor.u32 1.1754944e-38, %v1460_v63  ;;  %vm1459_vm5 = vcmp.eq.f32.partialorder %v1458_v8, 8.507059e+37 }
 0x35c   : > { %v1437_v24 = vmul.f32 %v1878_v43, %v1436_v10 }
 0x35e   : > { %v1438_v45 = vadd.f32 %v1878_v43, %v1437_v24 }
 0x35f   : > { %v1880_v49 = vpop.eup %1879 }
 0x360   : > { %v1442_v51 = vsel %vm1441_vm15, %v1878_v43, %v1438_v45  ;;  %v1450_v54 = vmul.f32 %v1880_v49, %v1371_v44  ;;  %vm1455_vm1 = vweird.f32 %v1880_v49  ;;  %v1525_v44 = vpop.permute.xlu2 %1524 }
 0x361   : > { %v1447_v57 = vsel %vm1444_vm0, %v1446_v50, %v1442_v51  ;;  %v1337_v58 = vpop.f32.mrf.mxu2  ;;  %vm1456_vm4 = vmor %vm1454_vm3, %vm1455_vm1 }
 0x362   : > { %v1498_v59 = vmul.f32 %v1447_v57, %v2516_v14  ;;  %v1451_v61 = vsub.f32 1.0, %v1450_v54  ;;  %v1338_v17 = vadd.f32 %v2544_v12, %v1337_v58 }
 0x364   : > { %v1538_v11 = vadd.f32 %v1519_v23, %v1498_v59  ;;  %v1452_v18 = vmul.f32 %v1880_v49, %v1451_v61  ;;  %v1769_v13 = vmul.f32 -1.442695, %v1338_v17 }
 0x366   : > { %v1546_v38 = vmax.f32 %v1538_v11, 0.0  ;;  %v1453_v39 = vadd.f32 %v1880_v49, %v1452_v18  ;;  %1881 = vpow2.f32 %v1769_v13 }
 0x368   : > { %1554 = vst.msk [vmem:[%s2552_s22 + $0x20] sm:$0xff] %vm484_vm2, %v1546_v38  ;;  %v1457_v14 = vsel %vm1456_vm4, %v1880_v49, %v1453_v39 }
 0x369   : > { %v1462_v0 = vsel %vm1459_vm5, %v1461_v52, %v1457_v14  ;;  %v1339_v21 = vpop.f32.mrf.mxu2 }
 0x36a   : > { %v1499_v3 = vmul.f32 %v1462_v0, %v2518_v4  ;;  %v1340_v62 = vadd.f32 %v2544_v12, %v1339_v21 }
 0x36c   : > { %v1882_v9 = vpop.eup %1881  ;;  %v1539_v15 = vadd.f32 %v1521_v6, %v1499_v3  ;;  %v1770_v16 = vmul.f32 -1.442695, %v1340_v62 }
 0x36d   : > { %v1372_v35 = vadd.f32 1.0, %v1882_v9 }
 0x36e   : > { %v1547_v46 = vmax.f32 %v1539_v15, 0.0  ;;  %1883 = vpow2.f32 %v1770_v16 }
 0x36f   : > { %1885 = vrcp.f32 %v1372_v35  ;;  %v1475_v60 = vand.u32 2147483648, %v1372_v35  ;;  %v1473_v12 = vand.u32 2147483647, %v1372_v35  ;;  %vm1469_vm7 = vweird.f32 %v1372_v35 }
 0x370   : > { %1555 = vst.msk [vmem:[%s2552_s22 + $0x28] sm:$0xff] %vm484_vm2, %v1547_v46 }
 0x371   : > { %v1476_v29 = vor.u32 1.1754944e-38, %v1475_v60  ;;  %vm1474_vm9 = vcmp.eq.f32.partialorder %v1473_v12, 8.507059e+37 }
 0x374   : > { %v1884_v37 = vpop.eup %1883 }
 0x375   : > { %v1886_v19 = vpop.eup %1885  ;;  %v1373_v25 = vadd.f32 1.0, %v1884_v37 }
 0x376   : > { %v1465_v41 = vmul.f32 %v1886_v19, %v1372_v35  ;;  %vm1470_vm6 = vweird.f32 %v1886_v19 }
 0x377   : > { %1887 = vrcp.f32 %v1373_v25  ;;  %vm1471_vm8 = vmor %vm1469_vm7, %vm1470_vm6  ;;  %v1490_v31 = vand.u32 2147483648, %v1373_v25  ;;  %v1488_v36 = vand.u32 2147483647, %v1373_v25  ;;  %vm1484_vm11 = vweird.f32 %v1373_v25 }
 0x378   : > { %v1466_v26 = vsub.f32 1.0, %v1465_v41 }
 0x379   : > { %v1491_v33 = vor.u32 1.1754944e-38, %v1490_v31  ;;  %vm1489_vm13 = vcmp.eq.f32.partialorder %v1488_v36, 8.507059e+37 }
 0x37a   : > { %v1467_v4 = vmul.f32 %v1886_v19, %v1466_v26 }
 0x37c   : > { %v1468_v55 = vadd.f32 %v1886_v19, %v1467_v4 }
 0x37d   : > { %v1888_v28 = vpop.eup %1887 }
 0x37e   : > { %v1472_v27 = vsel %vm1471_vm8, %v1886_v19, %v1468_v55  ;;  %v1480_v30 = vmul.f32 %v1888_v28, %v1373_v25  ;;  %vm1485_vm10 = vweird.f32 %v1888_v28 }
 0x37f   : > { %v1477_v20 = vsel %vm1474_vm9, %v1476_v29, %v1472_v27  ;;  %vm1486_vm12 = vmor %vm1484_vm11, %vm1485_vm10 }
 0x380   : > { %v1500_v48 = vmul.f32 %v1477_v20, %v2523_v40  ;;  %v1481_v1 = vsub.f32 1.0, %v1480_v30 }
 0x382   : > { %v1540_v32 = vadd.f32 %v1523_v56, %v1500_v48  ;;  %v1482_v34 = vmul.f32 %v1888_v28, %v1481_v1 }
 0x384   : > { %v1548_v53 = vmax.f32 %v1540_v32, 0.0  ;;  %v1483_v2 = vadd.f32 %v1888_v28, %v1482_v34 }
 0x386   : > { %1556 = vst.msk [vmem:[%s2552_s22 + $0x30] sm:$0xff] %vm484_vm2, %v1548_v53  ;;  %v1487_v40 = vsel %vm1486_vm12, %v1888_v28, %v1483_v2 }
 0x387   : > { %v1492_v42 = vsel %vm1489_vm13, %v1491_v33, %v1487_v40 }
 0x388   : > { %v1501_v43 = vmul.f32 %v1492_v42, %v2525_v5 }
 0x38a   : > { %v1541_v7 = vadd.f32 %v1525_v44, %v1501_v43 }
 0x38c   : > { %v1549_v10 = vmax.f32 %v1541_v7, 0.0 }
 0x38e   : > { %1557 = vst.msk [vmem:[%s2552_s22 + $0x38] sm:$0xff] %vm484_vm2, %v1549_v10 }
 0x38f   : > { %1916 = shalt.err (!%p1913_p3)
}
 0x390   : > { %s1961_s28 = smov 128   ;;  %s1962_s22 = smov 8  }
 0x391   : > { %1804 = dma.vmem_to_hbm [thread:$0]  (%p2056_p5), %s1572_s17, 1024, %s1574_s21, %s1559_s30, %s1961_s28, %s1961_s28, %s1962_s22  }
 0x392 PF: > { %p1810_p4 = scmp.ge.s32.totalorder %s1951_s16, 2  ;;  %s1588_s18 = sand.u32 1, %s1939_s13  }
 0x393   : > { %s1589_s26 = scalar_lea.sflag [#allocation5], %s1588_s18 }
 0x394   : > { %p1807_p7 = pnand %p1810_p4, %p2060_p6 }
 0x396   : > { %p1808_p8 = pneg %p1807_p7 }
 0x398   : > { %1934 = dma.done.wait (%p1808_p8), %s1589_s26, 1024  }
 0x399   : > { %1936 = vsyncadd (%p1808_p8), %s1589_s26, 4294966272  ;;  %s2634_s25 = sld [smem:[#allocation7_spill]]  ;;  %p20_p9 = scmp.ge.s32.totalorder %s2043_s19, 4  }
 0x39a   : > { %s2635_s13 = smov %s1943_s14  ;;  %s2636_s14 = smov %s1947_s15 }
 0x39b   : > { %s2638_s16 = smov %s2043_s19  ;;  %22 = sbr.rel (!%p20_p9) target bundleno = 3 (0x3), region = 95 }
 0x39f   : > { %s2637_s15 = smov %s2634_s25 }
 0x3a0   :  { %1595 = vsyncpa [#allocation5], 1 }
 0x3a1   :  { %1597 = vsyncpa [#allocation5 + $0x1], 1 }

</bundles_post_ra>
